<compile_context>
chip_gen: v7x
topology: tpu7x:2x2x1
jax: 0.10.0
libtpu: 0.0.40
codegen_flags: <defaults>
</compile_context>

<pallas_src>
import numpy as np
import jax
import jax.numpy as jnp
from jax import lax
from jax.experimental import pallas as pl
from jax.experimental.pallas import tpu as pltpu

# Geometry implied by the module for 28x28 single-channel inputs
# (nn.LazyLinear binds fc1 to 16*4*4 = 256 input features).
H_IN = 28                 # input spatial size
K = 5                     # conv kernel size
C1, H1, P1 = 6, 24, 12    # conv1: channels / valid-conv size / pooled size
C2, H2, P2 = 16, 8, 4     # conv2: channels / valid-conv size / pooled size
FC1, FC2 = 120, 84
LANES = 128               # lane width every operand is aligned to

# Static row offsets inside the two packed constant operands.
ROWS_W1 = K * LANES             # 640 rows per conv weight block (bf16 slab)
ROWS_FC1 = P2 * LANES           # 512 rows for the fc1 block (f32 slab)
OFF_FC2 = ROWS_FC1              # 512
OFF_FC3 = ROWS_FC1 + LANES      # 640
OFF_RS1 = ROWS_FC1 + 2 * LANES  # 768


def _round_up(v, m):
    return (v + m - 1) // m * m


def _off_rs2(batch):
    return OFF_RS1 + _round_up(2 * batch * P1, 8)


def _rows_fcsel(batch):
    return _off_rs2(batch) + _round_up(2 * batch * P2, 8)


# --------------------------------------------------------------------------
# Pallas kernel: whole CNN1 forward for the full batch, grid-free.
# --------------------------------------------------------------------------
def _cnn1_kernel(x_ref, wconv_ref, wfcsel_ref, out_ref):
    f32, bf16 = jnp.float32, jnp.bfloat16
    n = out_ref.shape[0]            # static batch size
    rows1 = n * H_IN                # 56 rows (image, input/conv1 row)
    rows2 = n * P1                  # 24 rows (image, pooled-1 row)

    def dot(a, b):
        return jnp.dot(a, b, preferred_element_type=f32)

    def im2col_rows(a, rows):
        # 5 block-level dy row shifts (one XLU sublane rotate each); every dy
        # piece sits at a 128-lane boundary so the concat is pure vreg
        # placement.  The garbage tail rows this leaves per image are trimmed
        # later by the row-pool selector matmul.
        pieces = [a if dy == 0 else pltpu.roll(a, shift=rows - dy, axis=0)
                  for dy in range(K)]
        return jnp.concatenate(pieces, axis=1)                  # (rows, 640)

    x = x_ref[...]                                 # (N*28, 128) f32, lane127==1

    # conv1 + bias + ReLU + 2x2 column-pool folded into ONE bf16 matmul + max.
    y1 = dot(im2col_rows(x, rows1).astype(bf16), wconv_ref[0:ROWS_W1, :])
    y1 = jnp.maximum(y1, 0.0)                                   # (N*28, 256)
    z1 = jnp.maximum(y1[:, :LANES], y1[:, LANES:])              # (N*28, 128)

    # 2x2 row-pool: merged even/odd selector matmul (also drops the 4 garbage
    # rows per image), then max of the stacked halves (sublane-aligned split).
    rs1 = wfcsel_ref[OFF_RS1:OFF_RS1 + 2 * rows2, 0:rows1]      # (2*N*12, N*28)
    p1f = dot(rs1, z1)                                          # (2*N*12, 128)
    p1 = jnp.maximum(p1f[:rows2, :], p1f[rows2:, :])            # (N*12, 128)

    # conv2 + bias + ReLU + column-pool: ONE bf16 matmul + max.
    y2 = dot(im2col_rows(p1, rows2).astype(bf16),
             wconv_ref[ROWS_W1:2 * ROWS_W1, :])
    y2 = jnp.maximum(y2, 0.0)                                   # (N*12, 256)
    z2 = jnp.maximum(y2[:, :LANES], y2[:, LANES:])              # (N*12, 128)

    off_rs2 = _off_rs2(n)
    rs2 = wfcsel_ref[off_rs2:off_rs2 + 2 * n * P2, 0:rows2]     # (2*N*4, N*12)
    p2f = dot(rs2, z2)                                          # (2*N*4, 128)
    p2 = jnp.maximum(p2f[:n * P2, :], p2f[n * P2:, :])          # (N*4, 128)
    # p2 rows are ordered (pooled-row j', image n) so the flatten below is a
    # 128-lane-aligned concat of contiguous row blocks.
    flat = jnp.concatenate([p2[j * n:(j + 1) * n, :] for j in range(P2)],
                           axis=1)                              # (N, 512)

    # Fully-connected head in f32 (biases folded via the constant-1 lane 127).
    h = jnp.maximum(dot(flat, wfcsel_ref[0:ROWS_FC1, :]), 0.0)            # (N,128)
    h = jnp.maximum(dot(h, wfcsel_ref[OFF_FC2:OFF_FC2 + LANES, :]), 0.0)  # (N,128)
    out = dot(h, wfcsel_ref[OFF_FC3:OFF_FC3 + LANES, :])                  # (N,128)
    out_ref[...] = out.astype(out_ref.dtype)


# --------------------------------------------------------------------------
# One-time wrapper-side weight / selector preparation (plain numpy).
# --------------------------------------------------------------------------
def _conv1_matrix(w1, b1):
    """(6,1,5,5)+(6,) -> (640, 256): conv + bias + column-pool folded in."""
    w1 = np.asarray(w1, np.float32)
    b1 = np.asarray(b1, np.float32)
    m = np.zeros((K * LANES, 2 * LANES), np.float32)
    for dy in range(K):
        for dx in range(K):
            for co in range(C1):
                for p in range(P1):
                    m[dy * LANES + 2 * p + dx, co * P1 + p] += w1[co, 0, dy, dx]
                    m[dy * LANES + 2 * p + 1 + dx,
                      LANES + co * P1 + p] += w1[co, 0, dy, dx]
    for co in range(C1):                     # bias via the constant-1 lane
        m[LANES - 1, co * P1:(co + 1) * P1] += b1[co]
        m[LANES - 1, LANES + co * P1:LANES + (co + 1) * P1] += b1[co]
    m[LANES - 1, LANES - 1] = 1.0            # carry the constant 1 onward
    m[LANES - 1, 2 * LANES - 1] = 1.0
    return m


def _conv2_matrix(w2, b2):
    """(16,6,5,5)+(16,) -> (640, 256): conv + bias + column-pool folded in."""
    w2 = np.asarray(w2, np.float32)
    b2 = np.asarray(b2, np.float32)
    m = np.zeros((K * LANES, 2 * LANES), np.float32)
    for dy in range(K):
        for c in range(C1):
            for dx in range(K):
                for co in range(C2):
                    for p in range(P2):
                        m[dy * LANES + c * P1 + 2 * p + dx,
                          co * P2 + p] += w2[co, c, dy, dx]
                        m[dy * LANES + c * P1 + 2 * p + 1 + dx,
                          LANES + co * P2 + p] += w2[co, c, dy, dx]
    for co in range(C2):
        m[LANES - 1, co * P2:(co + 1) * P2] += b2[co]
        m[LANES - 1, LANES + co * P2:LANES + (co + 1) * P2] += b2[co]
    m[LANES - 1, LANES - 1] = 1.0
    m[LANES - 1, 2 * LANES - 1] = 1.0
    return m


def _rowsel1(batch):
    """(2*N*12, N*28) stacked even/odd row-pool selector (also trims rows)."""
    m = np.zeros((2 * batch * P1, batch * H_IN), np.float32)
    for b in range(batch):
        for r in range(P1):
            m[b * P1 + r, b * H_IN + 2 * r] = 1.0
            m[batch * P1 + b * P1 + r, b * H_IN + 2 * r + 1] = 1.0
    return m


def _rowsel2(batch):
    """(2*N*4, N*12) stacked selector; output rows ordered (row j', image)."""
    m = np.zeros((2 * batch * P2, batch * P1), np.float32)
    for j in range(P2):
        for b in range(batch):
            m[j * batch + b, b * P1 + 2 * j] = 1.0
            m[batch * P2 + j * batch + b, b * P1 + 2 * j + 1] = 1.0
    return m


def _fc_blocks(params, num_classes):
    """fc1/fc2/fc3 as 128-lane padded blocks with biases on row 127."""
    fc1_w = np.asarray(params["fc1_w"], np.float32)   # (120, 256) torch (out,in)
    fc1_b = np.asarray(params["fc1_b"], np.float32)
    fc2_w = np.asarray(params["fc2_w"], np.float32)   # (84, 120)
    fc2_b = np.asarray(params["fc2_b"], np.float32)
    fc3_w = np.asarray(params["fc3_w"], np.float32)   # (nc, 84)
    fc3_b = np.asarray(params["fc3_b"], np.float32)

    # Kernel flatten order is lane = j'*128 + co*4 + p; torch order co*16+j'*4+p.
    w1p = np.zeros((ROWS_FC1, LANES), np.float32)
    for j in range(P2):
        for co in range(C2):
            for p in range(P2):
                w1p[j * LANES + co * P2 + p, :FC1] = \
                    fc1_w[:, co * P2 * P2 + j * P2 + p]
    w1p[LANES - 1, :FC1] = fc1_b            # bias only from the j'==0 block
    w1p[LANES - 1, LANES - 1] = 1.0

    w2p = np.zeros((LANES, LANES), np.float32)
    w2p[:FC1, :FC2] = fc2_w.T
    w2p[LANES - 1, :FC2] = fc2_b
    w2p[LANES - 1, LANES - 1] = 1.0

    w3p = np.zeros((LANES, LANES), np.float32)
    w3p[:FC2, :num_classes] = fc3_w.T
    w3p[LANES - 1, :num_classes] = fc3_b
    return w1p, w2p, w3p


def prepare_kernel_params(params, batch):
    """Build the two packed constant operands once (weight prep, not hot path)."""
    num_classes = np.asarray(params["fc3_w"]).shape[0]

    # bf16 conv slab: [conv1 ; conv2], each (640, 256).
    wconv = np.concatenate([_conv1_matrix(params["w1"], params["b1"]),
                            _conv2_matrix(params["w2"], params["b2"])], axis=0)

    # f32 slab: fc1 | fc2 | fc3 | row-pool selectors, all 128 lanes wide.
    w1p, w2p, w3p = _fc_blocks(params, num_classes)
    rs1, rs2 = _rowsel1(batch), _rowsel2(batch)
    off_rs2 = _off_rs2(batch)
    wfcsel = np.zeros((_rows_fcsel(batch), LANES), np.float32)
    wfcsel[0:ROWS_FC1] = w1p
    wfcsel[OFF_FC2:OFF_FC2 + LANES] = w2p
    wfcsel[OFF_FC3:OFF_FC3 + LANES] = w3p
    wfcsel[OFF_RS1:OFF_RS1 + rs1.shape[0], :rs1.shape[1]] = rs1
    wfcsel[off_rs2:off_rs2 + rs2.shape[0], :rs2.shape[1]] = rs2

    operands = (jnp.asarray(wconv, jnp.bfloat16),
                jnp.asarray(wfcsel, jnp.float32))
    return operands, num_classes


def cnn1_forward(x_nchw, kernel_operands, num_classes):
    """CNN1 forward.  Input is NCHW (N, 1, 28, 28) like the PyTorch module."""
    n = x_nchw.shape[0]
    assert x_nchw.shape[1:] == (1, H_IN, H_IN)
    wconv, wfcsel = kernel_operands

    x2d = jnp.asarray(x_nchw, jnp.float32).reshape(n * H_IN, H_IN)
    # Lane-pad to 128 and plant the constant-1 lane used for all bias folding.
    xpad = jnp.zeros((n * H_IN, LANES), jnp.float32)
    xpad = xpad.at[:, :H_IN].set(x2d).at[:, LANES - 1].set(1.0)

    vmem = lambda: pl.BlockSpec(memory_space=pltpu.MemorySpace.VMEM)
    out = pl.pallas_call(
        _cnn1_kernel,
        out_shape=jax.ShapeDtypeStruct((n, LANES), jnp.float32),
        in_specs=[vmem(), vmem(), vmem()],
        out_specs=vmem(),
    )(xpad, wconv, wfcsel)
    return out[:, :num_classes]


# --------------------------------------------------------------------------
# Pure-JAX (XLA) reference with exact PyTorch CNN1 semantics.
# --------------------------------------------------------------------------
def cnn1_reference(x, params):
    hp = lax.Precision.HIGHEST

    def conv_valid(inp, w, b):
        y = lax.conv_general_dilated(
            inp, w, (1, 1), "VALID",
            dimension_numbers=("NCHW", "OIHW", "NCHW"), precision=hp)
        return y + b[None, :, None, None]

    def maxpool2(y):
        n, c, h, w = y.shape
        return y.reshape(n, c, h // 2, 2, w // 2, 2).max(axis=(3, 5))

    y = maxpool2(jnp.maximum(conv_valid(x, params["w1"], params["b1"]), 0.0))
    y = maxpool2(jnp.maximum(conv_valid(y, params["w2"], params["b2"]), 0.0))
    y = y.reshape(y.shape[0], -1)                 # torch flatten: (C, H, W)
    y = jnp.maximum(jnp.dot(y, params["fc1_w"].T, precision=hp)
                    + params["fc1_b"], 0.0)
    y = jnp.maximum(jnp.dot(y, params["fc2_w"].T, precision=hp)
                    + params["fc2_b"], 0.0)
    return jnp.dot(y, params["fc3_w"].T, precision=hp) + params["fc3_b"]


if __name__ == "__main__":
    N, num_classes = 2, 10
    key = jax.random.PRNGKey(0)
    ks = jax.random.split(key, 11)

    x = jax.random.normal(ks[0], (N, 1, H_IN, H_IN), jnp.float32)
    params = {
        "w1":    0.20 * jax.random.normal(ks[1], (C1, 1, K, K), jnp.float32),
        "b1":    0.10 * jax.random.normal(ks[2], (C1,), jnp.float32),
        "w2":    0.08 * jax.random.normal(ks[3], (C2, C1, K, K), jnp.float32),
        "b2":    0.10 * jax.random.normal(ks[4], (C2,), jnp.float32),
        "fc1_w": 0.06 * jax.random.normal(ks[5], (FC1, C2 * P2 * P2), jnp.float32),
        "fc1_b": 0.10 * jax.random.normal(ks[6], (FC1,), jnp.float32),
        "fc2_w": 0.09 * jax.random.normal(ks[7], (FC2, FC1), jnp.float32),
        "fc2_b": 0.10 * jax.random.normal(ks[8], (FC2,), jnp.float32),
        "fc3_w": 0.10 * jax.random.normal(ks[9], (num_classes, FC2), jnp.float32),
        "fc3_b": 0.10 * jax.random.normal(ks[10], (num_classes,), jnp.float32),
    }

    kernel_ops, nc = prepare_kernel_params(params, N)
    out = jax.block_until_ready(cnn1_forward(x, kernel_ops, nc))
    ref = jax.block_until_ready(cnn1_reference(x, params))

    # Conv matmuls run with bf16 MXU inputs (f32 accumulate), so validate at a
    # bf16-appropriate tolerance against the f32 HIGHEST-precision reference.
    np.testing.assert_allclose(np.asarray(out), np.asarray(ref),
                               rtol=3e-2, atol=3e-2)
    assert out.shape == (N, num_classes) and out.dtype == jnp.float32
    print("KERNEL_OK")
</pallas_src>

<mosaic_0001>
module attributes {stable_mosaic.version = 11 : i64} {
  func.func @_cnn1_kernel(%arg0: memref<56x128xf32, #tpu.memory_space<vmem>>, %arg1: memref<1280x256xbf16, #tpu.memory_space<vmem>>, %arg2: memref<832x128xf32, #tpu.memory_space<vmem>>, %arg3: memref<2x128xf32, #tpu.memory_space<vmem>>) attributes {dimension_semantics = [], scalar_prefetch = 0 : i64, scratch_operands = 0 : i64, tpu.core_type = #tpu.core_type<tc>} {
    %c0 = arith.constant 0 : index
    %c0_0 = arith.constant 0 : index
    %0 = vector.load %arg0[%c0, %c0_0] : memref<56x128xf32, #tpu.memory_space<vmem>>, vector<56x128xf32>
    %c55_i32 = arith.constant 55 : i32
    %1 = tpu.dynamic_rotate %0 by %c55_i32 dim 0 : vector<56x128xf32>, i32 -> vector<56x128xf32>
    %c54_i32 = arith.constant 54 : i32
    %2 = tpu.dynamic_rotate %0 by %c54_i32 dim 0 : vector<56x128xf32>, i32 -> vector<56x128xf32>
    %c53_i32 = arith.constant 53 : i32
    %3 = tpu.dynamic_rotate %0 by %c53_i32 dim 0 : vector<56x128xf32>, i32 -> vector<56x128xf32>
    %c52_i32 = arith.constant 52 : i32
    %4 = tpu.dynamic_rotate %0 by %c52_i32 dim 0 : vector<56x128xf32>, i32 -> vector<56x128xf32>
    %5 = tpu.concatenate %0, %1, %2, %3, %4 in 1 : vector<56x128xf32>, vector<56x128xf32>, vector<56x128xf32>, vector<56x128xf32>, vector<56x128xf32> -> vector<56x640xf32>
    %6 = arith.truncf %5 : vector<56x640xf32> to vector<56x640xbf16>
    %c0_1 = arith.constant 0 : index
    %c0_2 = arith.constant 0 : index
    %7 = vector.load %arg1[%c0_1, %c0_2] : memref<1280x256xbf16, #tpu.memory_space<vmem>>, vector<640x256xbf16>
    %cst = arith.constant dense<0.000000e+00> : vector<56x256xf32>
    %8 = tpu.matmul %6, %7, %cst {dimension_numbers = #tpu.dot_dimension_numbers<[1], [0], [0], [1], [0, 0, 1, 1], [], []>} : vector<56x640xbf16>, vector<640x256xbf16>, vector<56x256xf32> -> vector<56x256xf32>
    %cst_3 = arith.constant 0.000000e+00 : f32
    %9 = vector.broadcast %cst_3 : f32 to vector<56x256xf32>
    %10 = arith.maximumf %8, %9 : vector<56x256xf32>
    %11 = vector.extract_strided_slice %10 {offsets = [0, 0], sizes = [56, 128], strides = [1, 1]} : vector<56x256xf32> to vector<56x128xf32>
    %12 = vector.extract_strided_slice %10 {offsets = [0, 128], sizes = [56, 128], strides = [1, 1]} : vector<56x256xf32> to vector<56x128xf32>
    %13 = arith.maximumf %11, %12 : vector<56x128xf32>
    %c768 = arith.constant 768 : index
    %c0_4 = arith.constant 0 : index
    %14 = vector.load %arg2[%c768, %c0_4] : memref<832x128xf32, #tpu.memory_space<vmem>>, vector<48x56xf32>
    %cst_5 = arith.constant dense<0.000000e+00> : vector<48x128xf32>
    %15 = tpu.matmul %14, %13, %cst_5 {dimension_numbers = #tpu.dot_dimension_numbers<[1], [0], [0], [1], [0, 0, 1, 1], [], []>} : vector<48x56xf32>, vector<56x128xf32>, vector<48x128xf32> -> vector<48x128xf32>
    %16 = vector.extract_strided_slice %15 {offsets = [0, 0], sizes = [24, 128], strides = [1, 1]} : vector<48x128xf32> to vector<24x128xf32>
    %17 = vector.extract_strided_slice %15 {offsets = [24, 0], sizes = [24, 128], strides = [1, 1]} : vector<48x128xf32> to vector<24x128xf32>
    %18 = arith.maximumf %16, %17 : vector<24x128xf32>
    %c23_i32 = arith.constant 23 : i32
    %19 = tpu.dynamic_rotate %18 by %c23_i32 dim 0 : vector<24x128xf32>, i32 -> vector<24x128xf32>
    %c22_i32 = arith.constant 22 : i32
    %20 = tpu.dynamic_rotate %18 by %c22_i32 dim 0 : vector<24x128xf32>, i32 -> vector<24x128xf32>
    %c21_i32 = arith.constant 21 : i32
    %21 = tpu.dynamic_rotate %18 by %c21_i32 dim 0 : vector<24x128xf32>, i32 -> vector<24x128xf32>
    %c20_i32 = arith.constant 20 : i32
    %22 = tpu.dynamic_rotate %18 by %c20_i32 dim 0 : vector<24x128xf32>, i32 -> vector<24x128xf32>
    %23 = tpu.concatenate %18, %19, %20, %21, %22 in 1 : vector<24x128xf32>, vector<24x128xf32>, vector<24x128xf32>, vector<24x128xf32>, vector<24x128xf32> -> vector<24x640xf32>
    %24 = arith.truncf %23 : vector<24x640xf32> to vector<24x640xbf16>
    %c640 = arith.constant 640 : index
    %c0_6 = arith.constant 0 : index
    %25 = vector.load %arg1[%c640, %c0_6] : memref<1280x256xbf16, #tpu.memory_space<vmem>>, vector<640x256xbf16>
    %cst_7 = arith.constant dense<0.000000e+00> : vector<24x256xf32>
    %26 = tpu.matmul %24, %25, %cst_7 {dimension_numbers = #tpu.dot_dimension_numbers<[1], [0], [0], [1], [0, 0, 1, 1], [], []>} : vector<24x640xbf16>, vector<640x256xbf16>, vector<24x256xf32> -> vector<24x256xf32>
    %cst_8 = arith.constant 0.000000e+00 : f32
    %27 = vector.broadcast %cst_8 : f32 to vector<24x256xf32>
    %28 = arith.maximumf %26, %27 : vector<24x256xf32>
    %29 = vector.extract_strided_slice %28 {offsets = [0, 0], sizes = [24, 128], strides = [1, 1]} : vector<24x256xf32> to vector<24x128xf32>
    %30 = vector.extract_strided_slice %28 {offsets = [0, 128], sizes = [24, 128], strides = [1, 1]} : vector<24x256xf32> to vector<24x128xf32>
    %31 = arith.maximumf %29, %30 : vector<24x128xf32>
    %c816 = arith.constant 816 : index
    %c0_9 = arith.constant 0 : index
    %32 = vector.load %arg2[%c816, %c0_9] : memref<832x128xf32, #tpu.memory_space<vmem>>, vector<16x24xf32>
    %cst_10 = arith.constant dense<0.000000e+00> : vector<16x128xf32>
    %33 = tpu.matmul %32, %31, %cst_10 {dimension_numbers = #tpu.dot_dimension_numbers<[1], [0], [0], [1], [0, 0, 1, 1], [], []>} : vector<16x24xf32>, vector<24x128xf32>, vector<16x128xf32> -> vector<16x128xf32>
    %34 = vector.extract_strided_slice %33 {offsets = [0, 0], sizes = [8, 128], strides = [1, 1]} : vector<16x128xf32> to vector<8x128xf32>
    %35 = vector.extract_strided_slice %33 {offsets = [8, 0], sizes = [8, 128], strides = [1, 1]} : vector<16x128xf32> to vector<8x128xf32>
    %36 = arith.maximumf %34, %35 : vector<8x128xf32>
    %37 = vector.extract_strided_slice %36 {offsets = [0, 0], sizes = [2, 128], strides = [1, 1]} : vector<8x128xf32> to vector<2x128xf32>
    %38 = vector.extract_strided_slice %36 {offsets = [2, 0], sizes = [2, 128], strides = [1, 1]} : vector<8x128xf32> to vector<2x128xf32>
    %39 = vector.extract_strided_slice %36 {offsets = [4, 0], sizes = [2, 128], strides = [1, 1]} : vector<8x128xf32> to vector<2x128xf32>
    %40 = vector.extract_strided_slice %36 {offsets = [6, 0], sizes = [2, 128], strides = [1, 1]} : vector<8x128xf32> to vector<2x128xf32>
    %41 = tpu.concatenate %37, %38, %39, %40 in 1 : vector<2x128xf32>, vector<2x128xf32>, vector<2x128xf32>, vector<2x128xf32> -> vector<2x512xf32>
    %c0_11 = arith.constant 0 : index
    %c0_12 = arith.constant 0 : index
    %42 = vector.load %arg2[%c0_11, %c0_12] : memref<832x128xf32, #tpu.memory_space<vmem>>, vector<512x128xf32>
    %cst_13 = arith.constant dense<0.000000e+00> : vector<2x128xf32>
    %43 = tpu.matmul %41, %42, %cst_13 {dimension_numbers = #tpu.dot_dimension_numbers<[1], [0], [0], [1], [0, 0, 1, 1], [], []>} : vector<2x512xf32>, vector<512x128xf32>, vector<2x128xf32> -> vector<2x128xf32>
    %cst_14 = arith.constant 0.000000e+00 : f32
    %44 = vector.broadcast %cst_14 : f32 to vector<2x128xf32>
    %45 = arith.maximumf %43, %44 : vector<2x128xf32>
    %c512 = arith.constant 512 : index
    %c0_15 = arith.constant 0 : index
    %46 = vector.load %arg2[%c512, %c0_15] : memref<832x128xf32, #tpu.memory_space<vmem>>, vector<128x128xf32>
    %cst_16 = arith.constant dense<0.000000e+00> : vector<2x128xf32>
    %47 = tpu.matmul %45, %46, %cst_16 {dimension_numbers = #tpu.dot_dimension_numbers<[1], [0], [0], [1], [0, 0, 1, 1], [], []>} : vector<2x128xf32>, vector<128x128xf32>, vector<2x128xf32> -> vector<2x128xf32>
    %cst_17 = arith.constant 0.000000e+00 : f32
    %48 = vector.broadcast %cst_17 : f32 to vector<2x128xf32>
    %49 = arith.maximumf %47, %48 : vector<2x128xf32>
    %c640_18 = arith.constant 640 : index
    %c0_19 = arith.constant 0 : index
    %50 = vector.load %arg2[%c640_18, %c0_19] : memref<832x128xf32, #tpu.memory_space<vmem>>, vector<128x128xf32>
    %cst_20 = arith.constant dense<0.000000e+00> : vector<2x128xf32>
    %51 = tpu.matmul %49, %50, %cst_20 {dimension_numbers = #tpu.dot_dimension_numbers<[1], [0], [0], [1], [0, 0, 1, 1], [], []>} : vector<2x128xf32>, vector<128x128xf32>, vector<2x128xf32> -> vector<2x128xf32>
    %c0_21 = arith.constant 0 : index
    %c0_22 = arith.constant 0 : index
    %52 = vector.load %arg3[%c0_21, %c0_22] : memref<2x128xf32, #tpu.memory_space<vmem>>, vector<2x128xf32>
    tpu.vector_store %arg3[%c0_21, %c0_22], %51 {strides = array<i32>} : memref<2x128xf32, #tpu.memory_space<vmem>>, vector<2x128xf32>,
    return
  }
}

</mosaic_0001>

<bundles_post_ra>
// kernel: tpu_custom_call.1
= control target key start
LH: loop header
LB: loop body
LE: loop exit
PB: predicated region body
PF: predicated region fallthrough
CT: control target
= control target key end

     0   :  { %8 = vsyncpa [#allocation3], 0  ;;  %s3456_s0 = inlined_call_operand.hbm [shape: f32[56,128], index: 0, kind: input, shape index: {}]   ;;  %s3457_s1 = inlined_call_operand.hbm [shape: bf16[1280,256], index: 1, kind: input, shape index: {}]   ;;  %s3458_s2 = inlined_call_operand.hbm [shape: f32[832,128], index: 2, kind: input, shape index: {}]   ;;  %s3459_s3 = inlined_call_operand.hbm [shape: f32[2,128], index: 3, kind: output, shape index: {}]  }
   0x1   :  { %9 = vsyncpa [#allocation6], 0 }
   0x2   :  { %10 = vsyncpa [#allocation4], 0  ;;  %s3058_s12 = smov [#allocation5]   ;;  %s3059_s14 = smov [#allocation2]  }
   0x3   :  { %s28_s13 = sshll.u32 %s3058_s12, 4  ;;  %s16_s15 = sshll.u32 %s3059_s14, 4  ;;  %s29_s13 = int_to_ptr.vmem [resolvable:$true] %s28_s13  ;;  %s3088_s15 = int_to_ptr.vmem [resolvable:$true] %s16_s15 }
   0x4   :  { %s2964_s18 = scalar_lea.hbm %s3457_s1, 20480 }
   0x5   :  { %p2965_p0 = scmp.ne.s32.totalorder %s3457_s1, %s2964_s18  ;;  %p2968_p1 = scmp.lt.u32.totalorder %s2964_s18, %s3457_s1 }
   0x7   :  { %p2970_p2 = pnand %p2968_p1, %p2965_p0 }
   0x9   :  { %2973 = shalt.err (!%p2970_p2)
}
   0xa   :  { %s2974_s23 = scalar_lea.vmem %s29_s13, 20480  ;;  %p2979_p4 = scmp.lt.s32.totalorder %s29_s13, %s29_s13 }
   0xb   :  { %p2975_p3 = scmp.ne.s32.totalorder %s29_s13, %s2974_s23  ;;  %p2980_p5 = scmp.lt.s32.totalorder %s2974_s23, %s2974_s23 }
   0xd   :  { %p2981_p6 = por %p2980_p5, %p2979_p4 }
   0xf   :  { %p2982_p7 = pnand %p2981_p6, %p2975_p3 }
  0x11   :  { %2985 = shalt.err (!%p2982_p7)
}
  0x12   :  { %s3060_s24 = smov 128   ;;  %s3061_s25 = smov 8  }
  0x13   :  { %34 = dma.hbm_to_vmem [thread:$0]  %s3457_s1, 20480, %s29_s13, [#allocation6], %s3060_s24, %s3060_s24, %s3061_s25  }
  0x14   :  { %s2986_s30 = scalar_lea.hbm %s3456_s0, 896 }
  0x15   :  { %p2987_p8 = scmp.ne.s32.totalorder %s3456_s0, %s2986_s30  ;;  %p2990_p9 = scmp.lt.u32.totalorder %s2986_s30, %s3456_s0 }
  0x17   :  { %p2992_p10 = pnand %p2990_p9, %p2987_p8 }
  0x19   :  { %2995 = shalt.err (!%p2992_p10)
}
  0x1a   :  { %s2996_s8 = scalar_lea.vmem %s3088_s15, 896  ;;  %p3001_p12 = scmp.lt.s32.totalorder %s3088_s15, %s3088_s15 }
  0x1b   :  { %p2997_p11 = scmp.ne.s32.totalorder %s3088_s15, %s2996_s8  ;;  %p3002_p13 = scmp.lt.s32.totalorder %s2996_s8, %s2996_s8 }
  0x1d   :  { %p3003_p0 = por %p3002_p13, %p3001_p12 }
  0x1f   :  { %p3004_p1 = pnand %p3003_p0, %p2997_p11 }
  0x21   :  { %3007 = shalt.err (!%p3004_p1)
}
  0x22   :  { %22 = dma.hbm_to_vmem [thread:$0]  %s3456_s0, 896, %s3088_s15, [#allocation3], %s3060_s24, %s3060_s24, %s3061_s25  }
  0x23   :  { %s3062_s10 = smov [#allocation7]   ;;  %s3008_s14 = scalar_lea.hbm %s3458_s2, 13312 }
  0x24   :  { %s40_s11 = sshll.u32 %s3062_s10, 4  ;;  %p3009_p2 = scmp.ne.s32.totalorder %s3458_s2, %s3008_s14  ;;  %s41_s11 = int_to_ptr.vmem [resolvable:$true] %s40_s11 }
  0x25   :  { %p3012_p3 = scmp.lt.u32.totalorder %s3008_s14, %s3458_s2 }
  0x27   :  { %p3014_p4 = pnand %p3012_p3, %p3009_p2 }
  0x29   :  { %3017 = shalt.err (!%p3014_p4)
}
  0x2a   :  { %s3018_s20 = scalar_lea.vmem %s41_s11, 13312  ;;  %p3023_p6 = scmp.lt.s32.totalorder %s41_s11, %s41_s11 }
  0x2b   :  { %p3019_p5 = scmp.ne.s32.totalorder %s41_s11, %s3018_s20  ;;  %p3024_p7 = scmp.lt.s32.totalorder %s3018_s20, %s3018_s20 }
  0x2d   :  { %p3025_p8 = por %p3024_p7, %p3023_p6 }
  0x2f   :  { %p3026_p9 = pnand %p3025_p8, %p3019_p5 }
  0x31   :  { %3029 = shalt.err (!%p3026_p9)
}
  0x32   :  { %46 = dma.hbm_to_vmem [thread:$0]  %s3458_s2, 13312, %s41_s11, [#allocation6], %s3060_s24, %s3060_s24, %s3061_s25  }
  0x33   :  { %3052 = dma.done.wait [#allocation3], 896  }
  0x34   :  { %3053 = vsyncadd [#allocation3], 4294966400 }
  0x35   :  { %3054 = dma.done.wait [#allocation6], 33792  }
  0x36   :  { %3055 = vsyncadd [#allocation6], 4294933504  ;;  %v2724_v0 = vld [vmem:[#allocation5 + $0x4] ss:$8 sps:$4 sm:$0xff]   ;;  %v2726_v1 = vld [vmem:[#allocation5] ss:$8 sps:$4 sm:$0xff]   ;;  %v71_v9 = vlaneseq }
  0x37   :  { %626 = vmatprep.subr.bf16.mxu0 %v2724_v0  ;;  %v2727_v2 = vld [vmem:[#allocation5 + $0x14] ss:$8 sps:$4 sm:$0xff]   ;;  %v2729_v3 = vld [vmem:[#allocation5 + $0x10] ss:$8 sps:$4 sm:$0xff]   ;;  %v2730_v4 = vld [vmem:[#allocation5 + $0x24] ss:$8 sps:$4 sm:$0xff]  }
  0x38   :  { %627 = vmatpush1.bf16.msra.mxu0 %v2726_v1  ;;  %v2732_v5 = vld [vmem:[#allocation5 + $0x20] ss:$8 sps:$4 sm:$0xff]   ;;  %v2733_v6 = vld [vmem:[#allocation5 + $0x34] ss:$8 sps:$4 sm:$0xff]   ;;  %v2735_v7 = vld [vmem:[#allocation5 + $0x30] ss:$8 sps:$4 sm:$0xff]  }
  0x39   :  { %628 = vmatprep.subr.bf16.mxu0 %v2727_v2  ;;  %v2736_v8 = vld [vmem:[#allocation5 + $0x44] ss:$8 sps:$4 sm:$0xff]   ;;  %v2738_v10 = vld [vmem:[#allocation5 + $0x40] ss:$8 sps:$4 sm:$0xff]   ;;  %v2739_v11 = vld [vmem:[#allocation5 + $0x54] ss:$8 sps:$4 sm:$0xff]  }
  0x3a   :  { %v3140_v12 = vshrl.u32 %v71_v9, 7  ;;  %v2741_v13 = vld [vmem:[#allocation5 + $0x50] ss:$8 sps:$4 sm:$0xff]   ;;  %v2742_v14 = vld [vmem:[#allocation5 + $0x64] ss:$8 sps:$4 sm:$0xff]   ;;  %vm866_vm4 = vcmask 457728  }
  0x3b   :  { %v3142_v15 = vld [vmem:[#allocation2] sm:$0xff]  ;;  %v3144_v16 = vld [vmem:[#allocation2 + $0x8] sm:$0xff]  ;;  %v3147_v17 = vld [vmem:[#allocation2 + $0x10] sm:$0xff]  ;;  %vm1661_vm5 = vcmask 195584   ;;  %vm3065_vm6 = vmmov 0   ;;  %s3067_s2 = smov [#allocation8]  }
  0x3c   :  { %629 = vmatpush1.bf16.msra.mxu0 %v2729_v3  ;;  %vm73_vm0 = vcmp.lt.s32.totalorder %v3140_v12, 7  ;;  %v64_v18 = vrot.slane %v3142_v15, 1  ;;  %v65_v19 = vrot.slane %v3144_v16, 1  ;;  %v2744_v20 = vld [vmem:[#allocation5 + $0x60] ss:$8 sps:$4 sm:$0xff]   ;;  %v66_v21 = vrot.slane %v3147_v17, 1 }
  0x3d   :  { %630 = vmatprep.subr.bf16.mxu0 %v2730_v4  ;;  %v2745_v22 = vld [vmem:[#allocation5 + $0x74] ss:$8 sps:$4 sm:$0xff]   ;;  %v81_v25 = vrot.slane %v3142_v15, 2  ;;  %vm88_vm1 = vcmp.lt.s32.totalorder %v3140_v12, 6  ;;  %v82_v27 = vrot.slane %v3144_v16, 2  ;;  %v83_v28 = vrot.slane %v3147_v17, 2 }
  0x3e   :  { %v79_v23 = vsel %vm73_vm0, %v64_v18, %v65_v19  ;;  %v78_v24 = vsel %vm73_vm0, %v65_v19, %v66_v21  ;;  %v2747_v29 = vld [vmem:[#allocation5 + $0x70] ss:$8 sps:$4 sm:$0xff]   ;;  %v2748_v30 = vld [vmem:[#allocation5 + $0x84] ss:$8 sps:$4 sm:$0xff]   ;;  %v111_v34 = vrot.slane %v3142_v15, 4  ;;  %v112_v35 = vrot.slane %v3144_v16, 4 }
  0x3f   :  { %v127_v26 = vpack.c.bf16 %v78_v24, %v79_v23  ;;  %v3166_v31 = vsel %vm88_vm1, %v82_v27, %v83_v28  ;;  %v3172_v32 = vsel %vm88_vm1, %v81_v25, %v82_v27  ;;  %v113_v36 = vrot.slane %v3147_v17, 4  ;;  %v2750_v37 = vld [vmem:[#allocation5 + $0x80] ss:$8 sps:$4 sm:$0xff]   ;;  %v2751_v39 = vld [vmem:[#allocation5 + $0x94] ss:$8 sps:$4 sm:$0xff]   ;;  %s2136_s21 = sshll.u32 %s3067_s2, 4  ;;  %s2137_s21 = int_to_ptr.vmem [resolvable:$true] %s2136_s21 }
  0x40   :  { %631 = vmatpush1.bf16.msra.mxu0 %v2732_v5  ;;  %v128_v33 = vpack.c.bf16 %v3166_v31, %v3172_v32  ;;  %vm118_vm2 = vcmp.lt.s32.totalorder %v3140_v12, 4  ;;  %v2753_v42 = vld [vmem:[#allocation5 + $0x90] ss:$8 sps:$4 sm:$0xff]   ;;  %v3192_v43 = vld [vmem:[#allocation2 + $0x18] sm:$0xff]  ;;  %v3196_v47 = vld [vmem:[#allocation2 + $0x20] sm:$0xff]  ;;  %v98_v48 = vrot.slane %v3147_v17, 3  ;;  %p3035_p11 = scmp.lt.s32.totalorder %s2137_s21, %s2137_s21 }
  0x41   :  { %632 = vmatprep.subr.bf16.mxu0 %v2733_v6  ;;  %658 = vmatprep.mubr.bf16.mxu0 %v127_v26  ;;  %v3184_v38 = vsel %vm118_vm2, %v111_v34, %v112_v35  ;;  %v3188_v40 = vsel %vm118_vm2, %v112_v35, %v113_v36  ;;  %v2754_v44 = vld [vmem:[#allocation5 + $0xa4] ss:$8 sps:$4 sm:$0xff]   ;;  %v99_v45 = vrot.slane %v3192_v43, 3  ;;  %v84_v46 = vrot.slane %v3192_v43, 2  ;;  %v2756_v51 = vld [vmem:[#allocation5 + $0xa0] ss:$8 sps:$4 sm:$0xff]  }
  0x42   :  { %v130_v41 = vpack.c.bf16 %v3188_v40, %v3184_v38  ;;  %vm103_vm3 = vcmp.lt.s32.totalorder %v3140_v12, 5  ;;  %v100_v49 = vrot.slane %v3196_v47, 3  ;;  %v2757_v52 = vld [vmem:[#allocation5 + $0xb4] ss:$8 sps:$4 sm:$0xff]   ;;  %v85_v54 = vrot.slane %v3196_v47, 2  ;;  %v860_v38 = vld [vmem:[#allocation7 + $0x300] sm:$0xff] }
  0x43   :  { %v3203_v50 = vsel %vm88_vm1, %v83_v28, %v84_v46  ;;  %v3209_v53 = vsel %vm103_vm3, %v98_v48, %v99_v45  ;;  %v3212_v55 = vld [vmem:[#allocation2 + $0x28] sm:$0xff]  ;;  %v114_v56 = vrot.slane %v3192_v43, 4  ;;  %v115_v57 = vrot.slane %v3196_v47, 4  ;;  %v3225_v61 = vld [vmem:[#allocation2 + $0x30] sm:$0xff]  ;;  %v2760_v2 = vld [vmem:[#allocation5 + $0xc4] ss:$8 sps:$4 sm:$0xff]   ;;  %2450 = vmatprep.mubr.msk.f32.mxu1 %vm866_vm4, %v860_v38 }
  0x44   :  { %633 = vmatpush1.bf16.msra.mxu0 %v2735_v7  ;;  %v3218_v58 = vsel %vm103_vm3, %v99_v45, %v100_v49  ;;  %v3222_v59 = vsel %vm88_vm1, %v84_v46, %v85_v54  ;;  %v101_v60 = vrot.slane %v3212_v55, 3  ;;  %v2759_v63 = vld [vmem:[#allocation5 + $0xb0] ss:$8 sps:$4 sm:$0xff]   ;;  %v102_v1 = vrot.slane %v3225_v61, 3  ;;  %v2763_v23 = vld [vmem:[#allocation5 + $0xd4] ss:$8 sps:$4 sm:$0xff]  }
  0x45   :  { %634 = vmatprep.subr.bf16.mxu0 %v2736_v8  ;;  %v134_v62 = vpack.c.bf16 %v3218_v58, %v3209_v53  ;;  %v133_v0 = vpack.c.bf16 %v3222_v59, %v3203_v50  ;;  %v86_v4 = vrot.slane %v3212_v55, 2  ;;  %v3239_v5 = vsel %vm118_vm2, %v114_v56, %v115_v57  ;;  %v2768_v35 = vld [vmem:[#allocation5 + $0xe0] ss:$8 sps:$4 sm:$0xff]   ;;  %v2834_v31 = vld [vmem:[#allocation5 + $0x244] ss:$8 sps:$4 sm:$0xff]   ;;  %s3030_s22 = scalar_lea.vmem %s2137_s21, 32 }
  0x46   :  { %v3234_v3 = vsel %vm103_vm3, %v100_v49, %v101_v60  ;;  %v3243_v6 = vsel %vm118_vm2, %v113_v36, %v114_v56  ;;  %v3249_v7 = vsel %vm103_vm3, %v101_v60, %v102_v1  ;;  %v87_v8 = vrot.slane %v3225_v61, 2  ;;  %v2769_v36 = vld [vmem:[#allocation5 + $0xf4] ss:$8 sps:$4 sm:$0xff]   ;;  %v2772_v46 = vld [vmem:[#allocation5 + $0x100] ss:$8 sps:$4 sm:$0xff]   ;;  %p3031_p10 = scmp.ne.s32.totalorder %s2137_s21, %s3030_s22  ;;  %p3036_p12 = scmp.lt.s32.totalorder %s3030_s22, %s3030_s22 }
  0x47   :  { %v135_v9 = vpack.c.bf16 %v3239_v5, %v3243_v6  ;;  %v126_v49 = vpack.c.bf16 %v3144_v16, %v3142_v15  ;;  %v70_v56 = vrot.slane %v3225_v61, 1  ;;  %v2780_v60 = vld [vmem:[#allocation5 + $0x124] ss:$8 sps:$4 sm:$0xff]   ;;  %v2837_v50 = vld [vmem:[#allocation5 + $0x254] ss:$8 sps:$4 sm:$0xff]  }
  0x48   :  { %635 = vmatpush1.bf16.msra.mxu0 %v2738_v10  ;;  %v139_v10 = vpack.c.bf16 %v3249_v7, %v3234_v3  ;;  %v3263_v19 = vsel %vm88_vm1, %v86_v4, %v87_v8  ;;  %v2835_v58 = vld [vmem:[#allocation5 + $0x250] ss:$8 sps:$4 sm:$0xff]   ;;  %v2840_v59 = vld [vmem:[#allocation5 + $0x264] ss:$8 sps:$4 sm:$0xff]   ;;  %p3037_p13 = por %p3036_p12, %p3035_p11 }
  0x49   :  { %636 = vmatprep.subr.bf16.mxu0 %v2739_v11  ;;  %v3258_v11 = vsel %vm88_vm1, %v85_v54, %v86_v4  ;;  %v69_v54 = vrot.slane %v3212_v55, 1  ;;  %v2783_v4 = vld [vmem:[#allocation5 + $0x134] ss:$8 sps:$4 sm:$0xff]   ;;  %v2870_v38 = vld [vmem:[#allocation5 + $0x304] ss:$8 sps:$4 sm:$0xff]  }
  0x4a   :  { %v138_v24 = vpack.c.bf16 %v3263_v19, %v3258_v11  ;;  %v2901_v12 = vld [vmem:[#allocation5 + $0x3b0] ss:$8 sps:$4 sm:$0xff]   ;;  %p3038_p0 = pnand %p3037_p13, %p3031_p10 }
  0x4c   :  { %637 = vmatpush1.bf16.msra.mxu0 %v2741_v13  ;;  %v116_v13 = vrot.slane %v3212_v55, 4 }
  0x4d   :  { %638 = vmatprep.subr.bf16.mxu0 %v2742_v14  ;;  %v2762_v14 = vld [vmem:[#allocation5 + $0xc0] ss:$8 sps:$4 sm:$0xff]  }
  0x4e   :  { %v3276_v26 = vsel %vm118_vm2, %v115_v57, %v116_v13  ;;  %v2775_v57 = vld [vmem:[#allocation5 + $0x110] ss:$8 sps:$4 sm:$0xff]  }
  0x50   :  { %639 = vmatpush1.bf16.msra.mxu0 %v2744_v20  ;;  %v3269_v20 = vsel %vm88_vm1, %v87_v8, %v81_v25  ;;  %v2765_v25 = vld [vmem:[#allocation5 + $0xd0] ss:$8 sps:$4 sm:$0xff]   ;;  %v131_v8 = vpack.c.bf16 %v3192_v43, %v3147_v17  ;;  %v2798_v17 = vld [vmem:[#allocation5 + $0x184] ss:$8 sps:$4 sm:$0xff]  }
  0x51   :  { %640 = vmatprep.subr.bf16.mxu0 %v2745_v22  ;;  %v117_v22 = vrot.slane %v3225_v61, 4 }
  0x53   :  { %v3280_v27 = vsel %vm118_vm2, %v116_v13, %v117_v22 }
  0x54   :  { %641 = vmatpush1.bf16.msra.mxu0 %v2747_v29  ;;  %v140_v28 = vpack.c.bf16 %v3280_v27, %v3276_v26  ;;  %v3288_v29 = vsel %vm118_vm2, %v117_v22, %v111_v34  ;;  %v2786_v22 = vld [vmem:[#allocation5 + $0x144] ss:$8 sps:$4 sm:$0xff]  }
  0x55   :  { %642 = vmatprep.subr.bf16.mxu0 %v2748_v30  ;;  %v2766_v30 = vld [vmem:[#allocation5 + $0xe4] ss:$8 sps:$4 sm:$0xff]   ;;  %v145_v3 = vpack.c.bf16 %v3288_v29, %v3288_v29 }
  0x58   :  { %643 = vmatpush1.bf16.msra.mxu0 %v2750_v37  ;;  %v67_v37 = vrot.slane %v3192_v43, 1 }
  0x59   :  { %644 = vmatprep.subr.bf16.mxu0 %v2751_v39  ;;  %v68_v39 = vrot.slane %v3196_v47, 1 }
  0x5a   :  { %v77_v34 = vsel %vm73_vm0, %v66_v21, %v67_v37  ;;  %v74_v21 = vsel %vm73_vm0, %v69_v54, %v70_v56 }
  0x5b   :  { %v76_v45 = vsel %vm73_vm0, %v67_v37, %v68_v39  ;;  %v97_v37 = vrot.slane %v3144_v16, 3  ;;  %v2790_v16 = vld [vmem:[#allocation5 + $0x160] ss:$8 sps:$4 sm:$0xff]  }
  0x5c   :  { %645 = vmatpush1.bf16.msra.mxu0 %v2753_v42  ;;  %v2771_v42 = vld [vmem:[#allocation5 + $0xf0] ss:$8 sps:$4 sm:$0xff]  }
  0x5d   :  { %646 = vmatprep.subr.bf16.mxu0 %v2754_v44  ;;  %v2774_v44 = vld [vmem:[#allocation5 + $0x104] ss:$8 sps:$4 sm:$0xff]  }
  0x60   :  { %647 = vmatpush1.bf16.msra.mxu0 %v2756_v51  ;;  %v2777_v51 = vld [vmem:[#allocation5 + $0x114] ss:$8 sps:$4 sm:$0xff]  }
  0x61   :  { %648 = vmatprep.subr.bf16.mxu0 %v2757_v52  ;;  %v132_v52 = vpack.c.bf16 %v76_v45, %v77_v34  ;;  %v2795_v45 = vld [vmem:[#allocation5 + $0x174] ss:$8 sps:$4 sm:$0xff]   ;;  %v2793_v34 = vld [vmem:[#allocation5 + $0x170] ss:$8 sps:$4 sm:$0xff]  }
  0x64   :  { %649 = vmatpush1.bf16.msra.mxu0 %v2759_v63  ;;  %v75_v63 = vsel %vm73_vm0, %v68_v39, %v69_v54  ;;  %v2787_v39 = vld [vmem:[#allocation5 + $0x150] ss:$8 sps:$4 sm:$0xff]   ;;  %v2807_v54 = vld [vmem:[#allocation5 + $0x1b4] ss:$8 sps:$4 sm:$0xff]  }
  0x65   :  { %650 = vmatprep.subr.bf16.mxu0 %v2760_v2  ;;  %v2778_v2 = vld [vmem:[#allocation5 + $0x120] ss:$8 sps:$4 sm:$0xff]   ;;  %v137_v13 = vpack.c.bf16 %v74_v21, %v75_v63  ;;  %v2813_v21 = vld [vmem:[#allocation5 + $0x1d4] ss:$8 sps:$4 sm:$0xff]   ;;  %v2811_v63 = vld [vmem:[#allocation5 + $0x1d0] ss:$8 sps:$4 sm:$0xff]  }
  0x68   :  { %651 = vmatpush1.bf16.msra.mxu0 %v2762_v14  ;;  %v2781_v14 = vld [vmem:[#allocation5 + $0x130] ss:$8 sps:$4 sm:$0xff]  }
  0x69   :  { %652 = vmatprep.subr.bf16.mxu0 %v2763_v23  ;;  %v80_v23 = vsel %vm73_vm0, %v70_v56, %v64_v18  ;;  %v108_v18 = vsel %vm103_vm3, %v97_v37, %v98_v48  ;;  %v2796_v48 = vld [vmem:[#allocation5 + $0x180] ss:$8 sps:$4 sm:$0xff]   ;;  %v2805_v56 = vld [vmem:[#allocation5 + $0x1b0] ss:$8 sps:$4 sm:$0xff]  }
  0x6a   :  { %v142_v43 = vpack.c.bf16 %v80_v23, %v80_v23  ;;  %v2825_v23 = vld [vmem:[#allocation5 + $0x214] ss:$8 sps:$4 sm:$0xff]  }
  0x6c   :  { %653 = vmatpush1.bf16.msra.mxu0 %v2765_v25  ;;  %v2784_v25 = vld [vmem:[#allocation5 + $0x140] ss:$8 sps:$4 sm:$0xff]  }
  0x6d   :  { %654 = vmatprep.subr.bf16.mxu0 %v2766_v30  ;;  %v2789_v30 = vld [vmem:[#allocation5 + $0x154] ss:$8 sps:$4 sm:$0xff]  }
  0x70   :  { %655 = vmatpush1.bf16.msra.mxu0 %v2768_v35  ;;  %v136_v35 = vpack.c.bf16 %v3212_v55, %v3196_v47  ;;  %v141_v55 = vpack.c.bf16 %v3225_v61, %v3225_v61  ;;  %v2838_v61 = vld [vmem:[#allocation5 + $0x260] ss:$8 sps:$4 sm:$0xff]  }
  0x71   :  { %656 = vmatprep.subr.bf16.mxu0 %v2769_v36  ;;  %v96_v36 = vrot.slane %v3142_v15, 3  ;;  %v143_v15 = vpack.c.bf16 %v3269_v20, %v3269_v20 }
  0x73   :  { %v109_v47 = vsel %vm103_vm3, %v96_v36, %v97_v37  ;;  %v2829_v37 = vld [vmem:[#allocation5 + $0x230] ss:$8 sps:$4 sm:$0xff]   ;;  %v110_v32 = vsel %vm103_vm3, %v102_v1, %v96_v36  ;;  %v3063_v1 = vmov 0  }
  0x74   :  { %657 = vmatpush1.bf16.msra.mxu0 %v2771_v42  ;;  %v2792_v42 = vld [vmem:[#allocation5 + $0x164] ss:$8 sps:$4 sm:$0xff]   ;;  %v144_v53 = vpack.c.bf16 %v110_v32, %v110_v32  ;;  %v2850_v32 = vld [vmem:[#allocation5 + $0x2a0] ss:$8 sps:$4 sm:$0xff]  }
  0x75   :  { %697 = vmatprep.subr.bf16.mxu0 %v2774_v44  ;;  %v129_v44 = vpack.c.bf16 %v108_v18, %v109_v47 }
  0x77   :  { %659 = vmatmul.mubr.bf16.vlgmr.msra.gmra.mrb[0].mxu0 %v126_v49  ;;  %v2799_v49 = vld [vmem:[#allocation5 + $0x190] ss:$8 sps:$4 sm:$0xff]  }
  0x78   :  { %698 = vmatpush1.bf16.msra.mxu0 %v2772_v46  ;;  %668 = vmatprep.mubr.bf16.mxu0 %v132_v52  ;;  %v2801_v46 = vld [vmem:[#allocation5 + $0x194] ss:$8 sps:$4 sm:$0xff]   ;;  %v2802_v52 = vld [vmem:[#allocation5 + $0x1a0] ss:$8 sps:$4 sm:$0xff]  }
  0x79   :  { %699 = vmatprep.subr.bf16.mxu0 %v2777_v51  ;;  %v2804_v51 = vld [vmem:[#allocation5 + $0x1a4] ss:$8 sps:$4 sm:$0xff]  }
  0x7c   :  { %700 = vmatpush1.bf16.msra.mxu0 %v2775_v57  ;;  %v2810_v57 = vld [vmem:[#allocation5 + $0x1c4] ss:$8 sps:$4 sm:$0xff]  }
  0x7d   :  { %701 = vmatprep.subr.bf16.mxu0 %v2780_v60  ;;  %v2808_v60 = vld [vmem:[#allocation5 + $0x1c0] ss:$8 sps:$4 sm:$0xff]  }
  0x7f   :  { %669 = vmatmul.mubr.bf16.gmra.mrb[4].mxu0 %v131_v8  ;;  %v2819_v8 = vld [vmem:[#allocation5 + $0x1f4] ss:$8 sps:$4 sm:$0xff]  }
  0x80   :  { %702 = vmatpush1.bf16.msra.mxu0 %v2778_v2  ;;  %678 = vmatprep.mubr.bf16.mxu0 %v137_v13  ;;  %v2816_v2 = vld [vmem:[#allocation5 + $0x1e4] ss:$8 sps:$4 sm:$0xff]   ;;  %v2817_v13 = vld [vmem:[#allocation5 + $0x1f0] ss:$8 sps:$4 sm:$0xff]  }
  0x81   :  { %703 = vmatprep.subr.bf16.mxu0 %v2783_v4  ;;  %v2814_v4 = vld [vmem:[#allocation5 + $0x1e0] ss:$8 sps:$4 sm:$0xff]  }
  0x84   :  { %704 = vmatpush1.bf16.msra.mxu0 %v2781_v14  ;;  %v2822_v14 = vld [vmem:[#allocation5 + $0x204] ss:$8 sps:$4 sm:$0xff]  }
  0x85   :  { %705 = vmatprep.subr.bf16.mxu0 %v2786_v22  ;;  %v2820_v22 = vld [vmem:[#allocation5 + $0x200] ss:$8 sps:$4 sm:$0xff]  }
  0x87   :  { %679 = vmatmul.mubr.bf16.gmra.mrb[8].mxu0 %v136_v35  ;;  %v2826_v35 = vld [vmem:[#allocation5 + $0x220] ss:$8 sps:$4 sm:$0xff]  }
  0x88   :  { %706 = vmatpush1.bf16.msra.mxu0 %v2784_v25  ;;  %688 = vmatprep.mubr.bf16.mxu0 %v142_v43  ;;  %v2823_v25 = vld [vmem:[#allocation5 + $0x210] ss:$8 sps:$4 sm:$0xff]   ;;  %v2831_v43 = vld [vmem:[#allocation5 + $0x234] ss:$8 sps:$4 sm:$0xff]  }
  0x89   :  { %707 = vmatprep.subr.bf16.mxu0 %v2789_v30  ;;  %v2828_v30 = vld [vmem:[#allocation5 + $0x224] ss:$8 sps:$4 sm:$0xff]  }
  0x8c   :  { %708 = vmatpush1.bf16.msra.mxu0 %v2787_v39 }
  0x8d   :  { %709 = vmatprep.subr.bf16.mxu0 %v2792_v42 }
  0x8f   :  { %689 = vmatmul.mubr.bf16.gmra.mrb[12].mxu0 %v141_v55 }
  0x90   :  { %710 = vmatpush1.bf16.msra.mxu0 %v2790_v16  ;;  %729 = vmatprep.mubr.bf16.mxu0 %v129_v44 }
  0x91   :  { %711 = vmatprep.subr.bf16.mxu0 %v2795_v45 }
  0x94   :  { %712 = vmatpush1.bf16.msra.mxu0 %v2793_v34 }
  0x95   :  { %713 = vmatprep.subr.bf16.mxu0 %v2798_v17 }
  0x98   :  { %714 = vmatpush1.bf16.msra.mxu0 %v2796_v48 }
  0x99   :  { %715 = vmatprep.subr.bf16.mxu0 %v2801_v46 }
  0x9c   :  { %716 = vmatpush1.bf16.msra.mxu0 %v2799_v49 }
  0x9d   :  { %717 = vmatprep.subr.bf16.mxu0 %v2804_v51 }
  0xa0   :  { %718 = vmatpush1.bf16.msra.mxu0 %v2802_v52 }
  0xa1   :  { %719 = vmatprep.subr.bf16.mxu0 %v2807_v54 }
  0xa4   :  { %720 = vmatpush1.bf16.msra.mxu0 %v2805_v56 }
  0xa5   :  { %721 = vmatprep.subr.bf16.mxu0 %v2810_v57 }
  0xa8   :  { %722 = vmatpush1.bf16.msra.mxu0 %v2808_v60 }
  0xa9   :  { %723 = vmatprep.subr.bf16.mxu0 %v2813_v21 }
  0xac   :  { %724 = vmatpush1.bf16.msra.mxu0 %v2811_v63 }
  0xad   :  { %725 = vmatprep.subr.bf16.mxu0 %v2816_v2 }
  0xb0   :  { %726 = vmatpush1.bf16.msra.mxu0 %v2814_v4 }
  0xb1   :  { %727 = vmatprep.subr.bf16.mxu0 %v2819_v8 }
  0xb4   :  { %728 = vmatpush1.bf16.msra.mxu0 %v2817_v13  ;;  %v2846_v13 = vld [vmem:[#allocation5 + $0x284] ss:$8 sps:$4 sm:$0xff]  }
  0xb5   :  { %768 = vmatprep.subr.bf16.mxu0 %v2822_v14  ;;  %v861_v14 = vld [vmem:[#allocation7 + $0x308] sm:$0xff] }
  0xb7   :  { %730 = vmatmul.mubr.bf16.vlgmr.msra.gmra.mrb[0].mxu0 %v128_v33  ;;  %v2832_v33 = vld [vmem:[#allocation5 + $0x240] ss:$8 sps:$4 sm:$0xff]  }
  0xb8   :  { %769 = vmatpush1.bf16.msra.mxu0 %v2820_v22  ;;  %739 = vmatprep.mubr.bf16.mxu0 %v134_v62  ;;  %v2843_v62 = vld [vmem:[#allocation5 + $0x274] ss:$8 sps:$4 sm:$0xff]   ;;  %v2844_v22 = vld [vmem:[#allocation5 + $0x280] ss:$8 sps:$4 sm:$0xff]  }
  0xb9   :  { %770 = vmatprep.subr.bf16.mxu0 %v2825_v23  ;;  %v862_v23 = vld [vmem:[#allocation7 + $0x310] sm:$0xff] }
  0xbc   :  { %771 = vmatpush1.bf16.msra.mxu0 %v2823_v25  ;;  %v2849_v25 = vld [vmem:[#allocation5 + $0x294] ss:$8 sps:$4 sm:$0xff]  }
  0xbd   :  { %772 = vmatprep.subr.bf16.mxu0 %v2828_v30  ;;  %v863_v30 = vld [vmem:[#allocation7 + $0x318] sm:$0xff] }
  0xbf   :  { %740 = vmatmul.mubr.bf16.gmra.mrb[4].mxu0 %v133_v0  ;;  %v2841_v0 = vld [vmem:[#allocation5 + $0x270] ss:$8 sps:$4 sm:$0xff]  }
  0xc0   :  { %773 = vmatpush1.bf16.msra.mxu0 %v2826_v35  ;;  %749 = vmatprep.mubr.bf16.mxu0 %v139_v10  ;;  %v2847_v35 = vld [vmem:[#allocation5 + $0x290] ss:$8 sps:$4 sm:$0xff]  }
  0xc1   :  { %774 = vmatprep.subr.bf16.mxu0 %v2831_v43  ;;  %v864_v43 = vld [vmem:[#allocation7 + $0x320] sm:$0xff] }
  0xc4   :  { %775 = vmatpush1.bf16.msra.mxu0 %v2829_v37  ;;  %v2852_v37 = vld [vmem:[#allocation5 + $0x2a4] ss:$8 sps:$4 sm:$0xff]  }
  0xc5   :  { %776 = vmatprep.subr.bf16.mxu0 %v2834_v31  ;;  %v865_v31 = vld [vmem:[#allocation7 + $0x328] sm:$0xff] }
  0xc7   :  { %750 = vmatmul.mubr.bf16.gmra.mrb[8].mxu0 %v138_v24 }
  0xc8   :  { %777 = vmatpush1.bf16.msra.mxu0 %v2832_v33  ;;  %759 = vmatprep.mubr.bf16.mxu0 %v144_v53  ;;  %v2855_v33 = vld [vmem:[#allocation5 + $0x2b4] ss:$8 sps:$4 sm:$0xff]   ;;  %v2853_v53 = vld [vmem:[#allocation5 + $0x2b0] ss:$8 sps:$4 sm:$0xff]  }
  0xc9   :  { %778 = vmatprep.subr.bf16.mxu0 %v2837_v50  ;;  %v2858_v50 = vld [vmem:[#allocation5 + $0x2c4] ss:$8 sps:$4 sm:$0xff]  }
  0xcc   :  { %779 = vmatpush1.bf16.msra.mxu0 %v2835_v58  ;;  %v2856_v58 = vld [vmem:[#allocation5 + $0x2c0] ss:$8 sps:$4 sm:$0xff]  }
  0xcd   :  { %780 = vmatprep.subr.bf16.mxu0 %v2840_v59  ;;  %v2861_v59 = vld [vmem:[#allocation5 + $0x2d4] ss:$8 sps:$4 sm:$0xff]  }
  0xcf   :  { %760 = vmatmul.mubr.bf16.gmra.mrb[12].mxu0 %v143_v15  ;;  %v2859_v15 = vld [vmem:[#allocation5 + $0x2d0] ss:$8 sps:$4 sm:$0xff]  }
  0xd0   :  { %781 = vmatpush1.bf16.msra.mxu0 %v2838_v61  ;;  %800 = vmatprep.mubr.bf16.mxu0 %v3063_v1  ;;  %v2864_v61 = vld [vmem:[#allocation5 + $0x2e4] ss:$8 sps:$4 sm:$0xff]  }
  0xd1   :  { %782 = vmatprep.subr.bf16.mxu0 %v2843_v62  ;;  %v2862_v62 = vld [vmem:[#allocation5 + $0x2e0] ss:$8 sps:$4 sm:$0xff]  }
  0xd4   :  { %783 = vmatpush1.bf16.msra.mxu0 %v2841_v0  ;;  %v2867_v0 = vld [vmem:[#allocation5 + $0x2f4] ss:$8 sps:$4 sm:$0xff]  }
  0xd7   :  { %801 = vmatmul.mubr.bf16.vlgmr.msra.gmra.mrb[0].mxu0 %v130_v41 }
  0xd8   :  { %810 = vmatprep.mubr.bf16.mxu0 %v3063_v1 }
  0xdf   :  { %811 = vmatmul.mubr.bf16.gmra.mrb[4].mxu0 %v135_v9 }
  0xe0   :  { %820 = vmatprep.mubr.bf16.mxu0 %v3063_v1 }
  0xe7   :  { %821 = vmatmul.mubr.bf16.gmra.mrb[8].mxu0 %v140_v28 }
  0xe8   :  { %830 = vmatprep.mubr.bf16.mxu0 %v3063_v1 }
  0xef   :  { %831 = vmatmul.mubr.bf16.gmra.mrb[12].mxu0 %v145_v3  ;;  %v2865_v3 = vld [vmem:[#allocation5 + $0x2f0] ss:$8 sps:$4 sm:$0xff]  }
 0x1aa   :  { %v802_v40 = vpop.f32.mrb[0].mxu0 }
 0x1ab   :  { %v839_v41 = vmax.f32 %v802_v40, 0.0  ;;  %v804_v5 = vpop.f32.mrb[1].mxu0  ;;  %v2868_v40 = vld [vmem:[#allocation5 + $0x300] ss:$8 sps:$4 sm:$0xff]  }
 0x1ac   :  { %v840_v6 = vmax.f32 %v804_v5, 0.0  ;;  %v806_v7 = vpop.f32.mrb[2].mxu0  ;;  %v2871_v5 = vld [vmem:[#allocation5 + $0x310] ss:$8 sps:$4 sm:$0xff]  }
 0x1ad   :  { %v841_v9 = vmax.f32 %v806_v7, 0.0  ;;  %v808_v10 = vpop.f32.mrb[3].mxu0  ;;  %v2874_v7 = vld [vmem:[#allocation5 + $0x320] ss:$8 sps:$4 sm:$0xff]  }
 0x1ae   :  { %v853_v11 = vmax.f32 %v839_v41, %v840_v6  ;;  %v842_v19 = vmax.f32 %v808_v10, 0.0  ;;  %v2873_v41 = vld [vmem:[#allocation5 + $0x314] ss:$8 sps:$4 sm:$0xff]   ;;  %v2876_v6 = vld [vmem:[#allocation5 + $0x324] ss:$8 sps:$4 sm:$0xff]  }
 0x1af   :  { %v2877_v10 = vld [vmem:[#allocation5 + $0x330] ss:$8 sps:$4 sm:$0xff]  }
 0x1b0   :  { %v854_v20 = vmax.f32 %v841_v9, %v842_v19  ;;  %v2879_v9 = vld [vmem:[#allocation5 + $0x334] ss:$8 sps:$4 sm:$0xff]   ;;  %v2880_v19 = vld [vmem:[#allocation5 + $0x340] ss:$8 sps:$4 sm:$0xff]  }
 0x1b2   :  { %v812_v24 = vpop.f32.mrb[4].mxu0  ;;  %v2538_v26 = vpack.c.bf16 %v854_v20, %v853_v11  ;;  %v2882_v11 = vld [vmem:[#allocation5 + $0x344] ss:$8 sps:$4 sm:$0xff]   ;;  %v2885_v20 = vld [vmem:[#allocation5 + $0x354] ss:$8 sps:$4 sm:$0xff]  }
 0x1b3   :  { %v843_v27 = vmax.f32 %v812_v24, 0.0  ;;  %v814_v28 = vpop.f32.mrb[5].mxu0  ;;  %v2883_v24 = vld [vmem:[#allocation5 + $0x350] ss:$8 sps:$4 sm:$0xff]  }
 0x1b4   :  { %v844_v29 = vmax.f32 %v814_v28, 0.0  ;;  %v816_v36 = vpop.f32.mrb[6].mxu0  ;;  %2539 = vmatprep.subr.bf16.mxu1 %v2538_v26  ;;  %v2891_v28 = vld [vmem:[#allocation5 + $0x374] ss:$8 sps:$4 sm:$0xff]  }
 0x1b5   :  { %v845_v39 = vmax.f32 %v816_v36, 0.0  ;;  %v818_v42 = vpop.f32.mrb[7].mxu0  ;;  %2541 = vmatpush3.bf16.msra.mxu1 %v2538_v26  ;;  %v2888_v26 = vld [vmem:[#allocation5 + $0x364] ss:$8 sps:$4 sm:$0xff]  }
 0x1b6   :  { %v855_v18 = vmax.f32 %v843_v27, %v844_v29  ;;  %v846_v47 = vmax.f32 %v818_v42, 0.0  ;;  %v2886_v27 = vld [vmem:[#allocation5 + $0x360] ss:$8 sps:$4 sm:$0xff]   ;;  %v2889_v29 = vld [vmem:[#allocation5 + $0x370] ss:$8 sps:$4 sm:$0xff]  }
 0x1b7   :  { %v2894_v36 = vld [vmem:[#allocation5 + $0x384] ss:$8 sps:$4 sm:$0xff]  }
 0x1b8   :  { %v856_v55 = vmax.f32 %v845_v39, %v846_v47 }
 0x1ba   :  { %v822_v16 = vpop.f32.mrb[8].mxu0  ;;  %v2542_v44 = vpack.c.bf16 %v856_v55, %v855_v18 }
 0x1bb   :  { %v847_v45 = vmax.f32 %v822_v16, 0.0  ;;  %v824_v34 = vpop.f32.mrb[9].mxu0 }
 0x1bc   :  { %v848_v17 = vmax.f32 %v824_v34, 0.0  ;;  %v826_v48 = vpop.f32.mrb[10].mxu0  ;;  %2543 = vmatprep.subr.bf16.mxu1 %v2542_v44 }
 0x1bd   :  { %v849_v46 = vmax.f32 %v826_v48, 0.0  ;;  %v828_v49 = vpop.f32.mrb[11].mxu0  ;;  %2545 = vmatpush3.bf16.msra.mxu1 %v2542_v44 }
 0x1be   :  { %v857_v51 = vmax.f32 %v847_v45, %v848_v17  ;;  %v850_v52 = vmax.f32 %v828_v49, 0.0 }
 0x1c0   :  { %v858_v54 = vmax.f32 %v849_v46, %v850_v52 }
 0x1c2   :  { %v832_v56 = vpop.f32.mrb[12].mxu0  ;;  %v2546_v57 = vpack.c.bf16 %v858_v54, %v857_v51 }
 0x1c3   :  { %v851_v60 = vmax.f32 %v832_v56, 0.0  ;;  %v834_v21 = vpop.f32.mrb[13].mxu0 }
 0x1c4   :  { %v852_v63 = vmax.f32 %v834_v21, 0.0  ;;  %v836_v2 = vpop.f32.mrb[14].mxu0  ;;  %2547 = vmatprep.subr.bf16.mxu1 %v2546_v57 }
 0x1c5   :  { %v837_v4 = vpop.f32.mrb[15].mxu0  ;;  %2549 = vmatpush3.bf16.msra.mxu1 %v2546_v57 }
 0x1c6   :  { %v859_v8 = vmax.f32 %v851_v60, %v852_v63 }
 0x1c8   :  { %2448 = vmatprep.subr.mxu1 %v859_v8 }
 0x1c9   :  { %2449 = vmatpush3.msra.mxu1 %v859_v8 }
 0x1ca   :  { %2451 = vmatmul.mubr.msk.f32.vlgmr.msra.gmra.mrb[0].mxu1 %vm866_vm4, %v861_v14  ;;  %1497 = vmatprep.subr.bf16.mxu1 %v2846_v13 }
 0x1cb   :  { %2453 = vmatprep.mubr.msk.f32.mxu1 %vm866_vm4, %v862_v23  ;;  %1498 = vmatpush1.bf16.msra.mxu1 %v2844_v22 }
 0x1cc   :  { %1499 = vmatprep.subr.bf16.mxu1 %v2849_v25  ;;  %v2892_v25 = vld [vmem:[#allocation5 + $0x380] ss:$8 sps:$4 sm:$0xff]  }
 0x1ce   :  { %2454 = vmatmul.mubr.msk.f32.gmra.mrb[2].mxu1 %vm866_vm4, %v863_v30 }
 0x1cf   :  { %2456 = vmatprep.mubr.msk.f32.mxu1 %vm866_vm4, %v864_v43  ;;  %1500 = vmatpush1.bf16.msra.mxu1 %v2847_v35 }
 0x1d0   :  { %1501 = vmatprep.subr.bf16.mxu1 %v2852_v37  ;;  %v2897_v37 = vld [vmem:[#allocation5 + $0x394] ss:$8 sps:$4 sm:$0xff]  }
 0x1d2   :  { %2457 = vmatmul.mubr.msk.f32.gmra.mrb[4].mxu1 %vm866_vm4, %v865_v31 }
 0x1d3   :  { %1502 = vmatpush1.bf16.msra.mxu1 %v2850_v32 }
 0x1d4   :  { %1503 = vmatprep.subr.bf16.mxu1 %v2855_v33 }
 0x1d7   :  { %1504 = vmatpush1.bf16.msra.mxu1 %v2853_v53 }
 0x1d8   :  { %1505 = vmatprep.subr.bf16.mxu1 %v2858_v50 }
 0x1db   :  { %1506 = vmatpush1.bf16.msra.mxu1 %v2856_v58 }
 0x1dc   :  { %1507 = vmatprep.subr.bf16.mxu1 %v2861_v59 }
 0x1df   :  { %1508 = vmatpush1.bf16.msra.mxu1 %v2859_v15 }
 0x1e0   :  { %1509 = vmatprep.subr.bf16.mxu1 %v2864_v61  ;;  %v2895_v61 = vld [vmem:[#allocation5 + $0x390] ss:$8 sps:$4 sm:$0xff]  }
 0x1e3   :  { %1510 = vmatpush1.bf16.msra.mxu1 %v2862_v62  ;;  %v2900_v62 = vld [vmem:[#allocation5 + $0x3a4] ss:$8 sps:$4 sm:$0xff]  }
 0x1e4   :  { %1511 = vmatprep.subr.bf16.mxu1 %v2867_v0  ;;  %v2898_v0 = vld [vmem:[#allocation5 + $0x3a0] ss:$8 sps:$4 sm:$0xff]  }
 0x1e7   :  { %1512 = vmatpush1.bf16.msra.mxu1 %v2865_v3 }
 0x1e8   :  { %1513 = vmatprep.subr.bf16.mxu1 %v2870_v38  ;;  %v2903_v38 = vld [vmem:[#allocation5 + $0x3b4] ss:$8 sps:$4 sm:$0xff]  }
 0x1eb   :  { %1514 = vmatpush1.bf16.msra.mxu1 %v2868_v40  ;;  %v2906_v40 = vld [vmem:[#allocation5 + $0x3c4] ss:$8 sps:$4 sm:$0xff]  }
 0x1ec   :  { %1515 = vmatprep.subr.bf16.mxu1 %v2873_v41  ;;  %v2904_v41 = vld [vmem:[#allocation5 + $0x3c0] ss:$8 sps:$4 sm:$0xff]  }
 0x1ef   :  { %1516 = vmatpush1.bf16.msra.mxu1 %v2871_v5  ;;  %v2909_v5 = vld [vmem:[#allocation5 + $0x3d4] ss:$8 sps:$4 sm:$0xff]  }
 0x1f0   :  { %1517 = vmatprep.subr.bf16.mxu1 %v2876_v6  ;;  %v2907_v6 = vld [vmem:[#allocation5 + $0x3d0] ss:$8 sps:$4 sm:$0xff]  }
 0x1f3   :  { %1518 = vmatpush1.bf16.msra.mxu1 %v2874_v7  ;;  %v2912_v7 = vld [vmem:[#allocation5 + $0x3e4] ss:$8 sps:$4 sm:$0xff]  }
 0x1f4   :  { %1519 = vmatprep.subr.bf16.mxu1 %v2879_v9  ;;  %v2910_v9 = vld [vmem:[#allocation5 + $0x3e0] ss:$8 sps:$4 sm:$0xff]  }
 0x1f7   :  { %1520 = vmatpush1.bf16.msra.mxu1 %v2877_v10  ;;  %v2915_v10 = vld [vmem:[#allocation5 + $0x3f4] ss:$8 sps:$4 sm:$0xff]  }
 0x1f8   :  { %1521 = vmatprep.subr.bf16.mxu1 %v2882_v11  ;;  %v2913_v11 = vld [vmem:[#allocation5 + $0x3f0] ss:$8 sps:$4 sm:$0xff]  }
 0x1fb   :  { %1522 = vmatpush1.bf16.msra.mxu1 %v2880_v19  ;;  %v2918_v19 = vld [vmem:[#allocation5 + $0x404] ss:$8 sps:$4 sm:$0xff]  }
 0x1fc   :  { %1523 = vmatprep.subr.bf16.mxu1 %v2885_v20  ;;  %v2916_v20 = vld [vmem:[#allocation5 + $0x400] ss:$8 sps:$4 sm:$0xff]  }
 0x1ff   :  { %1524 = vmatpush1.bf16.msra.mxu1 %v2883_v24  ;;  %v2921_v24 = vld [vmem:[#allocation5 + $0x414] ss:$8 sps:$4 sm:$0xff]  }
 0x200   :  { %1525 = vmatprep.subr.bf16.mxu1 %v2888_v26  ;;  %v2919_v26 = vld [vmem:[#allocation5 + $0x410] ss:$8 sps:$4 sm:$0xff]  }
 0x203   :  { %1526 = vmatpush1.bf16.msra.mxu1 %v2886_v27  ;;  %v2924_v27 = vld [vmem:[#allocation5 + $0x424] ss:$8 sps:$4 sm:$0xff]  }
 0x204   :  { %1527 = vmatprep.subr.bf16.mxu1 %v2891_v28  ;;  %v2922_v28 = vld [vmem:[#allocation5 + $0x420] ss:$8 sps:$4 sm:$0xff]  }
 0x207   :  { %1528 = vmatpush1.bf16.msra.mxu1 %v2889_v29  ;;  %v2927_v29 = vld [vmem:[#allocation5 + $0x434] ss:$8 sps:$4 sm:$0xff]  }
 0x208   :  { %1548 = vmatprep.subr.bf16.mxu1 %v2894_v36  ;;  %v2925_v36 = vld [vmem:[#allocation5 + $0x430] ss:$8 sps:$4 sm:$0xff]  }
 0x29d   :  { %v2452_v39 = vpop.f32.mrb[0].mxu1 }
 0x29e   :  { %v951_v42 = vpop.f32.mrb[1].mxu1 }
 0x2a1   :  { %v2455_v18 = vpop.f32.mrb[2].mxu1 }
 0x2a2   :  { %v980_v47 = vmax.f32 %v951_v42, %v2455_v18  ;;  %v961_v55 = vpop.f32.mrb[3].mxu1  ;;  %v2928_v42 = vld [vmem:[#allocation5 + $0x440] ss:$8 sps:$4 sm:$0xff]   ;;  %v2933_v18 = vld [vmem:[#allocation5 + $0x454] ss:$8 sps:$4 sm:$0xff]  }
 0x2a4   :  { %v989_v34 = vrot.slane %v980_v47, 2  ;;  %v983_v48 = vrot.slane %v980_v47, 1  ;;  %v995_v52 = vrot.slane %v980_v47, 3  ;;  %v1001_v8 = vrot.slane %v980_v47, 4 }
 0x2a5   :  { %v2458_v16 = vpop.f32.mrb[4].mxu1 }
 0x2a6   :  { %v982_v44 = vmax.f32 %v961_v55, %v2458_v16  ;;  %v971_v45 = vpop.f32.mrb[5].mxu1  ;;  %v2936_v55 = vld [vmem:[#allocation5 + $0x464] ss:$8 sps:$4 sm:$0xff]   ;;  %v2934_v16 = vld [vmem:[#allocation5 + $0x460] ss:$8 sps:$4 sm:$0xff]  }
 0x2a7   :  { %v981_v17 = vmax.f32 %v2452_v39, %v971_v45  ;;  %v2930_v39 = vld [vmem:[#allocation5 + $0x444] ss:$8 sps:$4 sm:$0xff]   ;;  %v2937_v45 = vld [vmem:[#allocation5 + $0x470] ss:$8 sps:$4 sm:$0xff]  }
 0x2a8   :  { %v991_v46 = vrot.slane %v982_v44, 2  ;;  %v1003_v49 = vrot.slane %v982_v44, 4  ;;  %v985_v51 = vrot.slane %v982_v44, 1  ;;  %v997_v2 = vrot.slane %v982_v44, 3 }
 0x2a9   :  { %v990_v54 = vrot.slane %v981_v17, 2  ;;  %v1002_v56 = vrot.slane %v981_v17, 4  ;;  %v984_v57 = vrot.slane %v981_v17, 1  ;;  %v1007_v60 = vpack.c.bf16 %v981_v17, %v980_v47  ;;  %v2931_v47 = vld [vmem:[#allocation5 + $0x450] ss:$8 sps:$4 sm:$0xff]  }
 0x2aa   :  { %v988_v21 = vsel %vm73_vm0, %v985_v51, %v983_v48  ;;  %v996_v63 = vrot.slane %v981_v17, 3  ;;  %v3374_v4 = vsel %vm88_vm1, %v991_v46, %v989_v34  ;;  %v3396_v33 = vsel %vm103_vm3, %v997_v2, %v995_v52  ;;  %v2940_v17 = vld [vmem:[#allocation5 + $0x480] ss:$8 sps:$4 sm:$0xff]  }
 0x2ab   :  { %v986_v13 = vsel %vm73_vm0, %v984_v57, %v985_v51  ;;  %v987_v14 = vsel %vm73_vm0, %v983_v48, %v984_v57  ;;  %v3382_v22 = vsel %vm88_vm1, %v990_v54, %v991_v46  ;;  %v3390_v43 = vsel %vm88_vm1, %v989_v34, %v990_v54  ;;  %v2942_v34 = vld [vmem:[#allocation5 + $0x484] ss:$8 sps:$4 sm:$0xff]   ;;  %v2945_v48 = vld [vmem:[#allocation5 + $0x494] ss:$8 sps:$4 sm:$0xff]   ;;  %v2949_v57 = vld [vmem:[#allocation5 + $0x4b0] ss:$8 sps:$4 sm:$0xff]  }
 0x2ac   :  { %v1008_v23 = vpack.c.bf16 %v986_v13, %v987_v14  ;;  %v998_v30 = vsel %vm103_vm3, %v996_v63, %v997_v2  ;;  %v999_v35 = vsel %vm103_vm3, %v995_v52, %v996_v63  ;;  %v1009_v32 = vpack.c.bf16 %v3382_v22, %v3390_v43  ;;  %v2948_v51 = vld [vmem:[#allocation5 + $0x4a4] ss:$8 sps:$4 sm:$0xff]   ;;  %v2946_v52 = vld [vmem:[#allocation5 + $0x4a0] ss:$8 sps:$4 sm:$0xff]   ;;  %v2957_v63 = vld [vmem:[#allocation5 + $0x4d4] ss:$8 sps:$4 sm:$0xff]  }
 0x2ad   :  { %v1010_v31 = vpack.c.bf16 %v998_v30, %v999_v35  ;;  %v1013_v53 = vpack.c.bf16 %v988_v21, %v988_v21  ;;  %v3400_v50 = vsel %vm118_vm2, %v1002_v56, %v1003_v49  ;;  %v3404_v58 = vsel %vm118_vm2, %v1001_v8, %v1002_v56  ;;  %v2951_v56 = vld [vmem:[#allocation5 + $0x4b4] ss:$8 sps:$4 sm:$0xff]   ;;  %v2952_v21 = vld [vmem:[#allocation5 + $0x4c0] ss:$8 sps:$4 sm:$0xff]   ;;  %v2955_v2 = vld [vmem:[#allocation5 + $0x4d0] ss:$8 sps:$4 sm:$0xff]  }
 0x2ae   :  { %1529 = vmatprep.mubr.bf16.mxu1 %v1008_v23  ;;  %v3408_v59 = vsel %vm118_vm2, %v1003_v49, %v1001_v8  ;;  %v1011_v15 = vpack.c.bf16 %v3400_v50, %v3404_v58  ;;  %v1012_v3 = vpack.c.bf16 %v982_v44, %v982_v44  ;;  %v2939_v44 = vld [vmem:[#allocation5 + $0x474] ss:$8 sps:$4 sm:$0xff]   ;;  %v1015_v46 = vpack.c.bf16 %v3396_v33, %v3396_v33  ;;  %v2943_v49 = vld [vmem:[#allocation5 + $0x490] ss:$8 sps:$4 sm:$0xff]   ;;  %v2960_v8 = vld [vmem:[#allocation5 + $0x4e4] ss:$8 sps:$4 sm:$0xff]  }
 0x2af   :  { %1530 = vmatmul.mubr.bf16.vlgmr.msra.gmra.mrb[8].mxu1 %v1007_v60  ;;  %v1014_v54 = vpack.c.bf16 %v3374_v4, %v3374_v4  ;;  %v2954_v60 = vld [vmem:[#allocation5 + $0x4c4] ss:$8 sps:$4 sm:$0xff]   ;;  %v2958_v13 = vld [vmem:[#allocation5 + $0x4e0] ss:$8 sps:$4 sm:$0xff]   ;;  %v2963_v4 = vld [vmem:[#allocation5 + $0x4f4] ss:$8 sps:$4 sm:$0xff]   ;;  %v1016_v22 = vpack.c.bf16 %v3408_v59, %v3408_v59 }
 0x2b0   :  { %1549 = vmatpush1.bf16.msra.mxu1 %v2892_v25  ;;  %1539 = vmatprep.mubr.bf16.mxu1 %v1013_v53  ;;  %v2961_v14 = vld [vmem:[#allocation5 + $0x4f0] ss:$8 sps:$4 sm:$0xff]   ;;  %v1767_v25 = vld [vmem:[#allocation7 + $0x80] sm:$0xff]  ;;  %v1768_v30 = vld [vmem:[#allocation7 + $0x88] sm:$0xff] }
 0x2b1   :  { %1550 = vmatprep.subr.bf16.mxu1 %v2897_v37  ;;  %v1659_v23 = vld [vmem:[#allocation7 + $0x330] sm:$0xff]  ;;  %v2554_v35 = vpack.c.bf16 %v1768_v30, %v1767_v25  ;;  %v1751_v43 = vld [vmem:[#allocation7] sm:$0xff]  ;;  %v1752_v37 = vld [vmem:[#allocation7 + $0x8] sm:$0xff] }
 0x2b2   :  { %v1770_v33 = vld [vmem:[#allocation7 + $0x98] sm:$0xff]  ;;  %v1771_v59 = vld [vmem:[#allocation7 + $0xa0] sm:$0xff] }
 0x2b3   :  { %2555 = vmatprep.subr.bf16.mxu0 %v2554_v35  ;;  %v1754_v50 = vld [vmem:[#allocation7 + $0x18] sm:$0xff] }
 0x2b4   :  { %1551 = vmatpush1.bf16.msra.mxu1 %v2895_v61  ;;  %v1660_v25 = vld [vmem:[#allocation7 + $0x338] sm:$0xff] }
 0x2b5   :  { %1552 = vmatprep.subr.bf16.mxu1 %v2900_v62  ;;  %v1755_v62 = vld [vmem:[#allocation7 + $0x20] sm:$0xff] }
 0x2b7   :  { %1540 = vmatmul.mubr.bf16.gmra.mrb[12].mxu1 %v1012_v3 }
 0x2b8   :  { %1553 = vmatpush1.bf16.msra.mxu1 %v2898_v0  ;;  %1580 = vmatprep.mubr.bf16.mxu1 %v1010_v31  ;;  %v2556_v31 = vpack.c.bf16 %v1752_v37, %v1751_v43  ;;  %v1756_v0 = vld [vmem:[#allocation7 + $0x28] sm:$0xff]  ;;  %v1785_v43 = vld [vmem:[#allocation7 + $0x110] sm:$0xff]  ;;  %v1786_v37 = vld [vmem:[#allocation7 + $0x118] sm:$0xff] }
 0x2b9   :  { %1554 = vmatprep.subr.bf16.mxu1 %v2903_v38  ;;  %v2564_v3 = vpack.c.bf16 %v1756_v0, %v1755_v62  ;;  %v1773_v38 = vld [vmem:[#allocation7 + $0xb0] sm:$0xff]  ;;  %v1790_v0 = vld [vmem:[#allocation7 + $0x138] sm:$0xff] }
 0x2ba   :  { %2557 = vmatpush3.bf16.msra.mxu0 %v2556_v31  ;;  %v1803_v31 = vld [vmem:[#allocation7 + $0x1a0] sm:$0xff]  ;;  %v1789_v62 = vld [vmem:[#allocation7 + $0x130] sm:$0xff] }
 0x2bc   :  { %1555 = vmatpush1.bf16.msra.mxu1 %v2901_v12  ;;  %v1774_v12 = vld [vmem:[#allocation7 + $0xb8] sm:$0xff] }
 0x2bd   :  { %1556 = vmatprep.subr.bf16.mxu1 %v2906_v40  ;;  %v2566_v40 = vpack.c.bf16 %v1774_v12, %v1773_v38  ;;  %v1808_v38 = vld [vmem:[#allocation7 + $0x1c8] sm:$0xff]  ;;  %v2600_v12 = vpack.c.bf16 %v1790_v0, %v1789_v62  ;;  %v1970_v62 = vld [vmem:[#allocation7 + $0x270] sm:$0xff]  ;;  %v1971_v0 = vld [vmem:[#allocation7 + $0x278] sm:$0xff] }
 0x2c0   :  { %1557 = vmatpush1.bf16.msra.mxu1 %v2904_v41  ;;  %v1757_v41 = vld [vmem:[#allocation7 + $0x30] sm:$0xff] }
 0x2c1   :  { %1558 = vmatprep.subr.bf16.mxu1 %v2909_v5  ;;  %v1758_v5 = vld [vmem:[#allocation7 + $0x38] sm:$0xff] }
 0x2c4   :  { %1559 = vmatpush1.bf16.msra.mxu1 %v2907_v6  ;;  %v2568_v6 = vpack.c.bf16 %v1758_v5, %v1757_v41  ;;  %v1791_v41 = vld [vmem:[#allocation7 + $0x140] sm:$0xff]  ;;  %v1792_v5 = vld [vmem:[#allocation7 + $0x148] sm:$0xff] }
 0x2c5   :  { %1560 = vmatprep.subr.bf16.mxu1 %v2912_v7  ;;  %v1775_v7 = vld [vmem:[#allocation7 + $0xc0] sm:$0xff] }
 0x2c8   :  { %1561 = vmatpush1.bf16.msra.mxu1 %v2910_v9  ;;  %v1776_v9 = vld [vmem:[#allocation7 + $0xc8] sm:$0xff] }
 0x2c9   :  { %1562 = vmatprep.subr.bf16.mxu1 %v2915_v10  ;;  %v2570_v10 = vpack.c.bf16 %v1776_v9, %v1775_v7  ;;  %v1810_v7 = vld [vmem:[#allocation7 + $0x1d8] sm:$0xff]  ;;  %v2604_v9 = vpack.c.bf16 %v1792_v5, %v1791_v41  ;;  %v2045_v41 = vld [vmem:[#allocation7 + $0x290] sm:$0xff] }
 0x2cc   :  { %1563 = vmatpush1.bf16.msra.mxu1 %v2913_v11  ;;  %v1759_v11 = vld [vmem:[#allocation7 + $0x40] sm:$0xff] }
 0x2cd   :  { %1564 = vmatprep.subr.bf16.mxu1 %v2918_v19  ;;  %v1760_v19 = vld [vmem:[#allocation7 + $0x48] sm:$0xff] }
 0x2d0   :  { %1565 = vmatpush1.bf16.msra.mxu1 %v2916_v20  ;;  %v2572_v20 = vpack.c.bf16 %v1760_v19, %v1759_v11  ;;  %v1793_v11 = vld [vmem:[#allocation7 + $0x150] sm:$0xff]  ;;  %v1794_v19 = vld [vmem:[#allocation7 + $0x158] sm:$0xff] }
 0x2d1   :  { %1566 = vmatprep.subr.bf16.mxu1 %v2921_v24  ;;  %v1777_v24 = vld [vmem:[#allocation7 + $0xd0] sm:$0xff] }
 0x2d4   :  { %1567 = vmatpush1.bf16.msra.mxu1 %v2919_v26  ;;  %v1778_v26 = vld [vmem:[#allocation7 + $0xd8] sm:$0xff] }
 0x2d5   :  { %1568 = vmatprep.subr.bf16.mxu1 %v2924_v27  ;;  %v2574_v27 = vpack.c.bf16 %v1778_v26, %v1777_v24  ;;  %v1812_v24 = vld [vmem:[#allocation7 + $0x1e8] sm:$0xff]  ;;  %v2608_v26 = vpack.c.bf16 %v1794_v19, %v1793_v11  ;;  %v2049_v19 = vld [vmem:[#allocation7 + $0x2b0] sm:$0xff] }
 0x2d8   :  { %1569 = vmatpush1.bf16.msra.mxu1 %v2922_v28  ;;  %v1761_v28 = vld [vmem:[#allocation7 + $0x50] sm:$0xff] }
 0x2d9   :  { %1570 = vmatprep.subr.bf16.mxu1 %v2927_v29  ;;  %v1762_v29 = vld [vmem:[#allocation7 + $0x58] sm:$0xff] }
 0x2dc   :  { %1571 = vmatpush1.bf16.msra.mxu1 %v2925_v36  ;;  %v2576_v36 = vpack.c.bf16 %v1762_v29, %v1761_v28  ;;  %v1763_v28 = vld [vmem:[#allocation7 + $0x60] sm:$0xff]  ;;  %v1764_v29 = vld [vmem:[#allocation7 + $0x68] sm:$0xff] }
 0x2dd   :  { %1572 = vmatprep.subr.bf16.mxu1 %v2930_v39  ;;  %v1779_v39 = vld [vmem:[#allocation7 + $0xe0] sm:$0xff] }
 0x2e0   :  { %1573 = vmatpush1.bf16.msra.mxu1 %v2928_v42  ;;  %v1780_v42 = vld [vmem:[#allocation7 + $0xe8] sm:$0xff] }
 0x2e1   :  { %1574 = vmatprep.subr.bf16.mxu1 %v2933_v18  ;;  %v2578_v18 = vpack.c.bf16 %v1780_v42, %v1779_v39  ;;  %v2580_v39 = vpack.c.bf16 %v1764_v29, %v1763_v28  ;;  %v1796_v42 = vld [vmem:[#allocation7 + $0x168] sm:$0xff]  ;;  %v2053_v29 = vld [vmem:[#allocation7 + $0x2d0] sm:$0xff] }
 0x2e4   :  { %1575 = vmatpush1.bf16.msra.mxu1 %v2931_v47 }
 0x2e5   :  { %1576 = vmatprep.subr.bf16.mxu1 %v2936_v55 }
 0x2e8   :  { %1577 = vmatpush1.bf16.msra.mxu1 %v2934_v16 }
 0x2e9   :  { %1578 = vmatprep.subr.bf16.mxu1 %v2939_v44 }
 0x2ec   :  { %1579 = vmatpush1.bf16.msra.mxu1 %v2937_v45 }
 0x2ed   :  { %1599 = vmatprep.subr.bf16.mxu1 %v2942_v34 }
 0x2ef   :  { %1581 = vmatmul.mubr.bf16.vlgmr.msra.gmra.mrb[8].mxu1 %v1009_v32  ;;  %v1769_v32 = vld [vmem:[#allocation7 + $0x90] sm:$0xff] }
 0x2f0   :  { %1590 = vmatprep.mubr.bf16.mxu1 %v1015_v46  ;;  %1600 = vmatpush1.bf16.msra.mxu1 %v2940_v17  ;;  %v2558_v53 = vpack.c.bf16 %v1770_v33, %v1769_v32  ;;  %v1804_v32 = vld [vmem:[#allocation7 + $0x1a8] sm:$0xff]  ;;  %v2592_v33 = vpack.c.bf16 %v1786_v37, %v1785_v43  ;;  %v1962_v43 = vld [vmem:[#allocation7 + $0x230] sm:$0xff]  ;;  %v1963_v37 = vld [vmem:[#allocation7 + $0x238] sm:$0xff] }
 0x2f1   :  { %1601 = vmatprep.subr.bf16.mxu1 %v2945_v48 }
 0x2f2   :  { %2559 = vmatprep.subr.bf16.mxu0 %v2558_v53  ;;  %v2594_v53 = vpack.c.bf16 %v1804_v32, %v1803_v31  ;;  %v2628_v31 = vpack.c.bf16 %v1963_v37, %v1962_v43  ;;  %v1964_v32 = vld [vmem:[#allocation7 + $0x240] sm:$0xff] }
 0x2f4   :  { %1602 = vmatpush1.bf16.msra.mxu1 %v2943_v49 }
 0x2f5   :  { %1603 = vmatprep.subr.bf16.mxu1 %v2948_v51 }
 0x2f7   :  { %1591 = vmatmul.mubr.bf16.gmra.mrb[12].mxu1 %v1014_v54 }
 0x2f8   :  { %1604 = vmatpush1.bf16.msra.mxu1 %v2946_v52  ;;  %1631 = vmatprep.mubr.bf16.mxu1 %v3063_v1 }
 0x2f9   :  { %1605 = vmatprep.subr.bf16.mxu1 %v2951_v56 }
 0x2fc   :  { %1606 = vmatpush1.bf16.msra.mxu1 %v2949_v57  ;;  %v1799_v57 = vld [vmem:[#allocation7 + $0x180] sm:$0xff] }
 0x2fd   :  { %1607 = vmatprep.subr.bf16.mxu1 %v2954_v60  ;;  %v1800_v60 = vld [vmem:[#allocation7 + $0x188] sm:$0xff] }
 0x300   :  { %1608 = vmatpush1.bf16.msra.mxu1 %v2952_v21 }
 0x301   :  { %1609 = vmatprep.subr.bf16.mxu1 %v2957_v63 }
 0x304   :  { %1610 = vmatpush1.bf16.msra.mxu1 %v2955_v2  ;;  %v1783_v2 = vld [vmem:[#allocation7 + $0x100] sm:$0xff] }
 0x305   :  { %1611 = vmatprep.subr.bf16.mxu1 %v2960_v8  ;;  %v1784_v8 = vld [vmem:[#allocation7 + $0x108] sm:$0xff] }
 0x306   :  { %v2588_v30 = vpack.c.bf16 %v1784_v8, %v1783_v2 }
 0x308   :  { %1612 = vmatpush1.bf16.msra.mxu1 %v2958_v13 }
 0x309   :  { %1613 = vmatprep.subr.bf16.mxu1 %v2963_v4  ;;  %v1801_v4 = vld [vmem:[#allocation7 + $0x190] sm:$0xff] }
 0x30c   :  { %1614 = vmatpush1.bf16.msra.mxu1 %v2961_v14  ;;  %v1802_v14 = vld [vmem:[#allocation7 + $0x198] sm:$0xff] }
 0x30d   :  { %v2590_v35 = vpack.c.bf16 %v1802_v14, %v1801_v4  ;;  %v1958_v14 = vld [vmem:[#allocation7 + $0x210] sm:$0xff] }
 0x30f   :  { %1632 = vmatmul.mubr.bf16.vlgmr.msra.gmra.mrb[8].mxu1 %v1011_v15  ;;  %v1772_v15 = vld [vmem:[#allocation7 + $0xa8] sm:$0xff] }
 0x310   :  { %1641 = vmatprep.mubr.bf16.mxu1 %v3063_v1  ;;  %v1753_v1 = vld [vmem:[#allocation7 + $0x10] sm:$0xff]  ;;  %v2562_v61 = vpack.c.bf16 %v1772_v15, %v1771_v59  ;;  %v1806_v59 = vld [vmem:[#allocation7 + $0x1b8] sm:$0xff] }
 0x311   :  { %v2560_v58 = vpack.c.bf16 %v1754_v50, %v1753_v1  ;;  %v1787_v1 = vld [vmem:[#allocation7 + $0x120] sm:$0xff]  ;;  %v1788_v50 = vld [vmem:[#allocation7 + $0x128] sm:$0xff] }
 0x312   :  { %v2596_v15 = vpack.c.bf16 %v1788_v50, %v1787_v1  ;;  %v1966_v1 = vld [vmem:[#allocation7 + $0x250] sm:$0xff]  ;;  %v1967_v50 = vld [vmem:[#allocation7 + $0x258] sm:$0xff] }
 0x313   :  { %2561 = vmatpush3.bf16.msra.mxu0 %v2560_v58  ;;  %v1805_v58 = vld [vmem:[#allocation7 + $0x1b0] sm:$0xff] }
 0x314   :  { %2563 = vmatprep.subr.bf16.mxu0 %v2562_v61  ;;  %v2598_v61 = vpack.c.bf16 %v1806_v59, %v1805_v58  ;;  %v2634_v58 = vpack.c.bf16 %v1967_v50, %v1966_v1  ;;  %v1968_v59 = vld [vmem:[#allocation7 + $0x260] sm:$0xff] }
 0x317   :  { %1642 = vmatmul.mubr.bf16.gmra.mrb[12].mxu1 %v1016_v22  ;;  %2565 = vmatpush3.bf16.msra.mxu0 %v2564_v3  ;;  %v1807_v3 = vld [vmem:[#allocation7 + $0x1c0] sm:$0xff] }
 0x318   :  { %2465 = vmatprep.mubr.msk.f32.mxu1 %vm1661_vm5, %v1659_v23  ;;  %2567 = vmatprep.subr.bf16.mxu0 %v2566_v40  ;;  %v2586_v23 = vpack.c.bf16 %v1800_v60, %v1799_v57  ;;  %v2602_v40 = vpack.c.bf16 %v1808_v38, %v1807_v3  ;;  %v1956_v60 = vld [vmem:[#allocation7 + $0x200] sm:$0xff]  ;;  %v2640_v3 = vpack.c.bf16 %v1971_v0, %v1970_v62  ;;  %v3066_v38 = vmov 0.0  }
 0x31b   :  { %2569 = vmatpush3.bf16.msra.mxu0 %v2568_v6  ;;  %v1809_v6 = vld [vmem:[#allocation7 + $0x1d0] sm:$0xff] }
 0x31c   :  { %2571 = vmatprep.subr.bf16.mxu0 %v2570_v10  ;;  %v2606_v10 = vpack.c.bf16 %v1810_v7, %v1809_v6  ;;  %v2046_v6 = vld [vmem:[#allocation7 + $0x298] sm:$0xff] }
 0x31d   :  { %v2646_v7 = vpack.c.bf16 %v2046_v6, %v2045_v41 }
 0x31f   :  { %2573 = vmatpush3.bf16.msra.mxu0 %v2572_v20  ;;  %v1811_v20 = vld [vmem:[#allocation7 + $0x1e0] sm:$0xff] }
 0x320   :  { %2575 = vmatprep.subr.bf16.mxu0 %v2574_v27  ;;  %v2610_v27 = vpack.c.bf16 %v1812_v24, %v1811_v20  ;;  %v2050_v20 = vld [vmem:[#allocation7 + $0x2b8] sm:$0xff] }
 0x321   :  { %v2652_v24 = vpack.c.bf16 %v2050_v20, %v2049_v19 }
 0x323   :  { %2577 = vmatpush3.bf16.msra.mxu0 %v2576_v36  ;;  %v1795_v36 = vld [vmem:[#allocation7 + $0x160] sm:$0xff] }
 0x324   :  { %2579 = vmatprep.subr.bf16.mxu0 %v2578_v18  ;;  %v2612_v18 = vpack.c.bf16 %v1796_v42, %v1795_v36  ;;  %v2054_v36 = vld [vmem:[#allocation7 + $0x2d8] sm:$0xff]  ;;  %v2055_v42 = vld [vmem:[#allocation7 + $0x2e0] sm:$0xff] }
 0x327   :  { %2581 = vmatpush3.bf16.msra.mxu0 %v2580_v39  ;;  %v2658_v39 = vpack.c.bf16 %v2054_v36, %v2053_v29 }
 0x3e2   :  { %v1633_v47 = vpop.f32.mrb[8].mxu1 }
 0x3e3   :  { %v1650_v55 = vmax.f32 %v1633_v47, 0.0  ;;  %v1635_v16 = vpop.f32.mrb[9].mxu1  ;;  %v1781_v47 = vld [vmem:[#allocation7 + $0xf0] sm:$0xff] }
 0x3e4   :  { %v1651_v44 = vmax.f32 %v1635_v16, 0.0  ;;  %v1637_v45 = vpop.f32.mrb[10].mxu1  ;;  %v1813_v16 = vld [vmem:[#allocation7 + $0x1f0] sm:$0xff] }
 0x3e5   :  { %v1652_v34 = vmax.f32 %v1637_v45, 0.0  ;;  %v1639_v17 = vpop.f32.mrb[11].mxu1  ;;  %v1814_v45 = vld [vmem:[#allocation7 + $0x1f8] sm:$0xff] }
 0x3e6   :  { %v1656_v48 = vmax.f32 %v1650_v55, %v1651_v44  ;;  %v1653_v46 = vmax.f32 %v1639_v17, 0.0  ;;  %v1782_v55 = vld [vmem:[#allocation7 + $0xf8] sm:$0xff] }
 0x3e7   :  { %v2582_v44 = vpack.c.bf16 %v1782_v55, %v1781_v47  ;;  %v1766_v17 = vld [vmem:[#allocation7 + $0x78] sm:$0xff] }
 0x3e8   :  { %v1657_v49 = vmax.f32 %v1652_v34, %v1653_v46  ;;  %v1765_v34 = vld [vmem:[#allocation7 + $0x70] sm:$0xff] }
 0x3e9   :  { %v2584_v46 = vpack.c.bf16 %v1766_v17, %v1765_v34  ;;  %2583 = vmatprep.subr.bf16.mxu0 %v2582_v44 }
 0x3ea   :  { %v1643_v51 = vpop.f32.mrb[12].mxu1  ;;  %v2550_v52 = vpack.c.bf16 %v1657_v49, %v1656_v48  ;;  %v2614_v48 = vpack.c.bf16 %v1814_v45, %v1813_v16  ;;  %v1797_v49 = vld [vmem:[#allocation7 + $0x170] sm:$0xff] }
 0x3eb   :  { %v1654_v54 = vmax.f32 %v1643_v51, 0.0  ;;  %v1645_v56 = vpop.f32.mrb[13].mxu1  ;;  %v1798_v51 = vld [vmem:[#allocation7 + $0x178] sm:$0xff]  ;;  %2585 = vmatpush3.bf16.msra.mxu0 %v2584_v46 }
 0x3ec   :  { %v1655_v21 = vmax.f32 %v1645_v56, 0.0  ;;  %v1647_v63 = vpop.f32.mrb[14].mxu1  ;;  %2551 = vmatprep.subr.bf16.mxu1 %v2550_v52 }
 0x3ed   :  { %v1648_v13 = vpop.f32.mrb[15].mxu1  ;;  %2553 = vmatpush3.bf16.msra.mxu1 %v2550_v52  ;;  %v2616_v52 = vpack.c.bf16 %v1798_v51, %v1797_v49  ;;  %v2057_v49 = vld [vmem:[#allocation7 + $0x2f0] sm:$0xff]  ;;  %v2058_v51 = vld [vmem:[#allocation7 + $0x2f8] sm:$0xff] }
 0x3ee   :  { %v1658_v22 = vmax.f32 %v1654_v54, %v1655_v21  ;;  %v3064_v54 = vmov 0.0|0.0   ;;  %v1957_v21 = vld [vmem:[#allocation7 + $0x208] sm:$0xff] }
 0x3ef   :  { %2618 = vmatprep.subr.bf16.mxu0 %v3064_v54  ;;  %v2619_v4 = vpack.c.bf16 %v1957_v21, %v1956_v60 }
 0x3f0   :  { %2463 = vmatprep.subr.mxu1 %v1658_v22 }
 0x3f1   :  { %2464 = vmatpush3.msra.mxu1 %v1658_v22  ;;  %v1959_v22 = vld [vmem:[#allocation7 + $0x218] sm:$0xff] }
 0x3f2   :  { %2466 = vmatmul.mubr.msk.f32.vlgmr.msra.gmra.mrb[6].mxu1 %vm1661_vm5, %v1660_v25  ;;  %2587 = vmatprep.subr.bf16.mxu1 %v2586_v23  ;;  %v2622_v23 = vpack.c.bf16 %v1959_v22, %v1958_v14  ;;  %v1960_v25 = vld [vmem:[#allocation7 + $0x220] sm:$0xff] }
 0x3f3   :  { %2589 = vmatpush3.bf16.msra.mxu1 %v2588_v30  ;;  %v1961_v30 = vld [vmem:[#allocation7 + $0x228] sm:$0xff] }
 0x3f4   :  { %2591 = vmatprep.subr.bf16.mxu1 %v2590_v35  ;;  %v2625_v35 = vpack.c.bf16 %v1961_v30, %v1960_v25 }
 0x3f7   :  { %2593 = vmatpush3.bf16.msra.mxu1 %v2592_v33  ;;  %v1965_v33 = vld [vmem:[#allocation7 + $0x248] sm:$0xff] }
 0x3f8   :  { %2595 = vmatprep.subr.bf16.mxu1 %v2594_v53  ;;  %v2631_v53 = vpack.c.bf16 %v1965_v33, %v1964_v32 }
 0x3fb   :  { %2597 = vmatpush3.bf16.msra.mxu1 %v2596_v15  ;;  %v1969_v15 = vld [vmem:[#allocation7 + $0x268] sm:$0xff] }
 0x3fc   :  { %2599 = vmatprep.subr.bf16.mxu1 %v2598_v61  ;;  %v2637_v61 = vpack.c.bf16 %v1969_v15, %v1968_v59 }
 0x3ff   :  { %2601 = vmatpush3.bf16.msra.mxu1 %v2600_v12  ;;  %v2043_v12 = vld [vmem:[#allocation7 + $0x280] sm:$0xff] }
 0x400   :  { %2603 = vmatprep.subr.bf16.mxu1 %v2602_v40  ;;  %v2044_v40 = vld [vmem:[#allocation7 + $0x288] sm:$0xff] }
 0x401   :  { %v2643_v5 = vpack.c.bf16 %v2044_v40, %v2043_v12 }
 0x403   :  { %2605 = vmatpush3.bf16.msra.mxu1 %v2604_v9  ;;  %v2047_v9 = vld [vmem:[#allocation7 + $0x2a0] sm:$0xff] }
 0x404   :  { %2607 = vmatprep.subr.bf16.mxu1 %v2606_v10  ;;  %v2048_v10 = vld [vmem:[#allocation7 + $0x2a8] sm:$0xff] }
 0x405   :  { %v2649_v11 = vpack.c.bf16 %v2048_v10, %v2047_v9 }
 0x407   :  { %2609 = vmatpush3.bf16.msra.mxu1 %v2608_v26  ;;  %v2051_v26 = vld [vmem:[#allocation7 + $0x2c0] sm:$0xff] }
 0x408   :  { %2611 = vmatprep.subr.bf16.mxu1 %v2610_v27  ;;  %v2052_v27 = vld [vmem:[#allocation7 + $0x2c8] sm:$0xff] }
 0x409   :  { %v2655_v28 = vpack.c.bf16 %v2052_v27, %v2051_v26 }
 0x40b   :  { %2613 = vmatpush3.bf16.msra.mxu1 %v2612_v18  ;;  %v2056_v18 = vld [vmem:[#allocation7 + $0x2e8] sm:$0xff] }
 0x40c   :  { %2615 = vmatprep.subr.bf16.mxu1 %v2614_v48  ;;  %v2661_v47 = vpack.c.bf16 %v2056_v18, %v2055_v42 }
 0x40f   :  { %2617 = vmatpush3.bf16.msra.mxu1 %v2616_v52  ;;  %v2664_v52 = vpack.c.bf16 %v2058_v51, %v2057_v49 }
 0x410   :  { %2642 = vmatprep.subr.bf16.mxu1 %v3064_v54 }
 0x4c5   :  { %v2467_v56 = vpop.f32.mrb[6].mxu1 }
 0x4c6   :  { %v1734_v57 = vpop.f32.mrb[7].mxu1 }
 0x4c7   :  { %v1743_v63 = vmax.f32 %v1734_v57, %v2467_v56 }
 0x4c9   :  { %v1745_v2 = vrot.slane %v1743_v63, 2  ;;  %v1749_v8 = vrot.slane %v1743_v63, 6  ;;  %v1747_v13 = vrot.slane %v1743_v63, 4 }
 0x4cb   :  { %1879 = vmatprep.mubr.f32.mxu0 %v1745_v2  ;;  %1949 = vmatprep.mubr.f32.mxu1 %v1749_v8 }
 0x4cc   :  { %1880 = vmatmul.mubr.f32.vlgmr.msra.gmra.mrb[16].mxu0 %v1743_v63  ;;  %1950 = vmatmul.mubr.f32.vlgmr.msra.gmra.mrb[16].mxu1 %v1747_v13 }
 0x4cd   :  { %2620 = vmatpush3.bf16.msra.mxu0 %v2619_v4  ;;  %2500 = vmatprep.mubr.msk.f32.mxu0 %vm3065_vm6, %v3066_v38 }
 0x4ce   :  { %2621 = vmatprep.subr.bf16.mxu0 %v3064_v54  ;;  %2535 = vmatprep.mubr.msk.f32.mxu1 %vm3065_vm6, %v3066_v38 }
 0x4cf   :  { %2644 = vmatpush3.bf16.msra.mxu1 %v2643_v5 }
 0x4d0   :  { %2645 = vmatprep.subr.bf16.mxu1 %v3064_v54 }
 0x4d1   :  { %2623 = vmatpush3.bf16.msra.mxu0 %v2622_v23 }
 0x4d2   :  { %2624 = vmatprep.subr.bf16.mxu0 %v3064_v54 }
 0x4d3   :  { %2647 = vmatpush3.bf16.msra.mxu1 %v2646_v7 }
 0x4d4   :  { %2648 = vmatprep.subr.bf16.mxu1 %v3064_v54 }
 0x4d5   :  { %2626 = vmatpush3.bf16.msra.mxu0 %v2625_v35 }
 0x4d6   :  { %2627 = vmatprep.subr.bf16.mxu0 %v3064_v54 }
 0x4d7   :  { %2650 = vmatpush3.bf16.msra.mxu1 %v2649_v11 }
 0x4d8   :  { %2651 = vmatprep.subr.bf16.mxu1 %v3064_v54 }
 0x4d9   :  { %2629 = vmatpush3.bf16.msra.mxu0 %v2628_v31 }
 0x4da   :  { %2630 = vmatprep.subr.bf16.mxu0 %v3064_v54 }
 0x4db   :  { %2653 = vmatpush3.bf16.msra.mxu1 %v2652_v24 }
 0x4dc   :  { %2654 = vmatprep.subr.bf16.mxu1 %v3064_v54 }
 0x4dd   :  { %2632 = vmatpush3.bf16.msra.mxu0 %v2631_v53 }
 0x4de   :  { %2633 = vmatprep.subr.bf16.mxu0 %v3064_v54 }
 0x4df   :  { %2656 = vmatpush3.bf16.msra.mxu1 %v2655_v28 }
 0x4e0   :  { %2657 = vmatprep.subr.bf16.mxu1 %v3064_v54 }
 0x4e1   :  { %2635 = vmatpush3.bf16.msra.mxu0 %v2634_v58 }
 0x4e2   :  { %2636 = vmatprep.subr.bf16.mxu0 %v3064_v54 }
 0x4e3   :  { %2659 = vmatpush3.bf16.msra.mxu1 %v2658_v39 }
 0x4e4   :  { %2660 = vmatprep.subr.bf16.mxu1 %v3064_v54 }
 0x4e5   :  { %2638 = vmatpush3.bf16.msra.mxu0 %v2637_v61 }
 0x4e6   :  { %2639 = vmatprep.subr.bf16.mxu0 %v3064_v54 }
 0x4e7   :  { %2662 = vmatpush3.bf16.msra.mxu1 %v2661_v47 }
 0x4e8   :  { %2663 = vmatprep.subr.bf16.mxu1 %v3064_v54 }
 0x4e9   :  { %2641 = vmatpush3.bf16.msra.mxu0 %v2640_v3 }
 0x4eb   :  { %2665 = vmatpush3.bf16.msra.mxu1 %v2664_v52 }
 0x59f   :  { %v2364_v55 = vpop.f32.mrb[16].mxu0  ;;  %v2399_v16 = vpop.f32.mrb[16].mxu1 }
 0x5a0   :  { %v2365_v44 = vpop.f32.mrb[17].mxu0  ;;  %v2400_v45 = vpop.f32.mrb[17].mxu1 }
 0x5a1   :  { %v2366_v34 = vadd.f32 %v2365_v44, %v2364_v55  ;;  %v2401_v17 = vadd.f32 %v2400_v45, %v2399_v16 }
 0x5a3   :  { %v1952_v48 = vadd.f32 %v2401_v17, %v2366_v34 }
 0x5a5   :  { %v1955_v46 = vmax.f32 %v1952_v48, 0.0 }
 0x5a7   :  { %2501 = vmatmul.mubr.f32.vlgmr.msra.gmra.mrb[18].mxu0 %v1955_v46 }
 0x67a   :  { %v2038_v56 = vpop.f32.mrb[18].mxu0 }
 0x67b   :  { %v2042_v57 = vmax.f32 %v2038_v56, 0.0  ;;  %v2502_v60 = vpop.f32.mrb[19].mxu0 }
 0x67d   :  { %2536 = vmatmul.mubr.f32.vlgmr.msra.gmra.mrb[18].mxu1 %v2042_v57 }
 0x750   :  { %v2125_v54 = vpop.f32.mrb[18].mxu1 }
 0x751   :  { %2129 = vst [vmem:[#allocation8] sm:$0x3] %v2125_v54  ;;  %v2537_v21 = vpop.f32.mrb[19].mxu1 }
 0x752   :  { %3041 = shalt.err (!%p3038_p0)
}
 0x753   :  { %s3042_s25 = scalar_lea.hbm %s3459_s3, 32 }
 0x754   :  { %p3043_p1 = scmp.ne.s32.totalorder %s3459_s3, %s3042_s25  ;;  %p3046_p2 = scmp.lt.u32.totalorder %s3042_s25, %s3459_s3 }
 0x756   :  { %p3048_p3 = pnand %p3046_p2, %p3043_p1 }
 0x758   :  { %3051 = shalt.err (!%p3048_p3)
}
 0x759   :  { %2139 = dma.vmem_to_hbm [thread:$0]  %s2137_s21, 32, %s3459_s3, [#allocation4]  }
 0x75a   :  { %3056 = dma.done.wait [#allocation4], 32  }
 0x75b   :  { %3057 = vsyncadd [#allocation4], 4294967264 }
 0x75c   :  { %2143 = vsyncpa [#allocation3], 1 }
 0x75d   :  { %2144 = vsyncpa [#allocation6], 1 }
 0x75e   :  { %2145 = vsyncpa [#allocation4], 1 }

</bundles_post_ra>
